<compile_context>
chip_gen: v7x
topology: tpu7x:2x2x1
jax: 0.10.0
libtpu: 0.0.40
codegen_flags: <defaults>
</compile_context>

<pallas_src>
import functools

import jax
import jax.numpy as jnp
from jax.experimental import pallas as pl
from jax.experimental.pallas import tpu as pltpu


# ----------------------------------------------------------------- fused kernel

def _spatial_proj_kernel(x_ref, w1_ref, w2_ref, w3_ref, b_ref, o_ref, *, w):
    """One image per grid step, (channels, flattened pixels) layout.

    x_ref  : (C_in,  H*W)  one image; column p = i*W + j
    w1_ref : (C_out, C_in) bf16, (W1 @ Wf)^T   -- fc_1 folded in
    w2_ref : (C_out, C_in) bf16, (W2 @ Wf)^T
    w3_ref : (C_out, C_in) bf16, (W3 @ Wf)^T
    b_ref  : (C_out, 1)    f32,  (b1 + b2 + b3) @ Wf + bf
    o_ref  : (C_out, H*W)
    """
    c_in, hw = x_ref.shape
    x = x_ref[...].astype(jnp.float32)

    # Lane-position (j = p % W) and channel-group (c % 7) masks, built once.
    jpos = jax.lax.broadcasted_iota(jnp.int32, (c_in, hw), 1) % w
    cmod = jax.lax.broadcasted_iota(jnp.int32, (c_in, hw), 0) % 7

    def roll(a, s):
        # out[c, p] = a[c, (p - s) % HW]  (jnp.roll convention) -- XLU, not VALU.
        s = s % hw
        if s == 0:
            return a
        return pltpu.roll(a, s, axis=1)

    def wshift(a, v):
        # Per-row cyclic column shift: out[c, i*W + j] = a[c, i*W + (j + v) % W]
        # (two whole-tile lane rolls blended by the column-position mask).
        vp = v % w
        if vp == 0:
            return a
        return jnp.where(jpos < (w - vp), roll(a, -vp), roll(a, w - vp))

    xh = roll(x, w)       # xh[c, i, j] = x[c, (i-1)%H, j]
    xw = wshift(x, -1)    # xw[c, i, j] = x[c, i, (j-1)%W]

    # CycleFC offsets (spec): delta_i = c % sh - 1, delta_j = (c // sh) % sw - 1
    #   cycle1 (sh=1, sw=7): (i-1,           j + c%7 - 1)
    #   cycle2 (sh=1, sw=1): (i-1,           j-1)
    #   cycle3 (sh=7, sw=1): (i + c%7 - 1,   j-1)
    x2 = x                                   # overwritten at r == 0
    s1_terms, s3_terms = [], []
    for r in range(min(7, c_in)):
        s1 = wshift(xh, r - 1)               # x[(i-1)%H,     (j + r-1)%W]
        s3 = roll(xw, (1 - r) * w)           # x[(i + r-1)%H, (j-1)%W]
        if r == 0:
            x2 = s1                          # cycle2 is the uniform (-1, -1) shift
        sel = cmod == r                      # disjoint channel groups -> independent terms
        s1_terms.append(jnp.where(sel, s1, 0.0))
        s3_terms.append(jnp.where(sel, s3, 0.0))

    def _tree_sum(ts):                       # pairwise tree: independent adds -> VALU ILP
        while len(ts) > 1:
            ts = [a + b for a, b in zip(ts[::2], ts[1::2])] + (
                [ts[-1]] if len(ts) % 2 else [])
        return ts[0]

    x1 = _tree_sum(s1_terms)
    x3 = _tree_sum(s3_terms)

    # Three accumulated bf16 MXU dots (fc_1 already folded into the weights),
    # f32 accumulation, lane-dense (C_out, HW) store.
    acc = jnp.dot(w1_ref[...], x1.astype(jnp.bfloat16),
                  preferred_element_type=jnp.float32)
    acc += jnp.dot(w2_ref[...], x2.astype(jnp.bfloat16),
                   preferred_element_type=jnp.float32)
    acc += jnp.dot(w3_ref[...], x3.astype(jnp.bfloat16),
                   preferred_element_type=jnp.float32)
    o_ref[...] = (acc + b_ref[...]).astype(o_ref.dtype)


# ----------------------------------------------------------------- wrapper

def spatial_proj_forward(x_nchw, params):
    """Spatial_Proj forward.  NCHW in -> NCHW out: (B, C_in, H, W) -> (B, C_out, H, W)."""
    b, c_in, h, w = x_nchw.shape
    hw = h * w
    c_out = params['fc_w'].shape[1]
    if c_in % 8 != 0 or c_out % 8 != 0:
        raise ValueError("channel counts must be multiples of 8 for TPU sublane tiling")
    if hw % 128 != 0:
        raise ValueError("H*W must be a multiple of 128 for lane-dense TPU tiling")

    # NCHW -> (B*C_in, H*W) is a pure reshape: no transpose, no extra HBM round-trip.
    x = x_nchw.reshape(b * c_in, hw)

    # Fold fc_1 into each CycleFC weight:
    #   (x1@W1 + x2@W2 + x3@W3 + b_sum) @ Wf + bf
    #     = x1@(W1@Wf) + x2@(W2@Wf) + x3@(W3@Wf) + (b_sum@Wf + bf)
    # Stored transposed for the (C, HW) layout; weights cast to bf16 for the MXU.
    wf = params['fc_w'].astype(jnp.float32)
    w1t = (params['w1'].astype(jnp.float32) @ wf).T.astype(jnp.bfloat16)
    w2t = (params['w2'].astype(jnp.float32) @ wf).T.astype(jnp.bfloat16)
    w3t = (params['w3'].astype(jnp.float32) @ wf).T.astype(jnp.bfloat16)
    b_sum = (params['b1'] + params['b2'] + params['b3']).astype(jnp.float32)
    b_fold = (b_sum @ wf + params['fc_b']).reshape(c_out, 1).astype(jnp.float32)

    kernel = functools.partial(_spatial_proj_kernel, w=w)
    y = pl.pallas_call(
        kernel,
        out_shape=jax.ShapeDtypeStruct((b * c_out, hw), x_nchw.dtype),
        grid=(b,),
        in_specs=[pl.BlockSpec((c_in, hw), lambda i: (i, 0)),
                  pl.BlockSpec((c_out, c_in), lambda i: (0, 0)),
                  pl.BlockSpec((c_out, c_in), lambda i: (0, 0)),
                  pl.BlockSpec((c_out, c_in), lambda i: (0, 0)),
                  pl.BlockSpec((c_out, 1), lambda i: (0, 0))],
        out_specs=pl.BlockSpec((c_out, hw), lambda i: (i, 0)),
        compiler_params=pltpu.CompilerParams(dimension_semantics=("parallel",)),
    )(x, w1t, w2t, w3t, b_fold)

    # (B*C_out, H*W) -> NCHW is again a pure reshape.
    return y.reshape(b, c_out, h, w)


# ----------------------------------------------------------------- plain-JAX reference

def _cycle_fc_ref(x_nhwc, w_mlp, bias, sh, sw):
    _, h, w, c = x_nhwc.shape
    ch = jnp.arange(c)
    di = ch % sh - 1
    dj = (ch // sh) % sw - 1
    ii = (jnp.arange(h)[:, None] + di[None, :]) % h       # (H, C)
    jj = (jnp.arange(w)[:, None] + dj[None, :]) % w       # (W, C)
    xg = jnp.take_along_axis(x_nhwc, ii[None, :, None, :], axis=1)
    xg = jnp.take_along_axis(xg, jj[None, None, :, :], axis=2)
    return jnp.einsum('bhwc,cd->bhwd', xg, w_mlp,
                      precision=jax.lax.Precision.HIGHEST) + bias


def spatial_proj_reference(x_nchw, params):
    x = jnp.transpose(x_nchw, (0, 2, 3, 1))
    s = (_cycle_fc_ref(x, params['w1'], params['b1'], 1, 7)
         + _cycle_fc_ref(x, params['w2'], params['b2'], 1, 1)
         + _cycle_fc_ref(x, params['w3'], params['b3'], 7, 1))
    y = jnp.einsum('bhwc,cd->bhwd', s, params['fc_w'],
                   precision=jax.lax.Precision.HIGHEST) + params['fc_b']
    return jnp.transpose(y, (0, 3, 1, 2))


# ----------------------------------------------------------------- main

if __name__ == "__main__":
    key = jax.random.PRNGKey(0)
    ks = jax.random.split(key, 9)

    # Spatial_Proj(in_channels=32, out_channels=32) on a (8, 32, 16, 16) input.
    # B = 8 keeps shapes tiny but gives every TensorCore >= 4 pipelined grid steps.
    B, C, H, W = 8, 32, 16, 16
    x = jax.random.normal(ks[0], (B, C, H, W), jnp.float32)

    sc = 1.0 / jnp.sqrt(jnp.float32(C))
    params = {
        'w1': jax.random.normal(ks[1], (C, C), jnp.float32) * sc,   # CycleFC(sh=1, sw=7)
        'w2': jax.random.normal(ks[2], (C, C), jnp.float32) * sc,   # CycleFC(sh=1, sw=1)
        'w3': jax.random.normal(ks[3], (C, C), jnp.float32) * sc,   # CycleFC(sh=7, sw=1)
        'b1': jax.random.normal(ks[4], (C,), jnp.float32) * sc,
        'b2': jax.random.normal(ks[5], (C,), jnp.float32) * sc,
        'b3': jax.random.normal(ks[6], (C,), jnp.float32) * sc,
        'fc_w': jax.random.normal(ks[7], (C, C), jnp.float32) * sc,  # stored (in, out)
        'fc_b': jax.random.normal(ks[8], (C,), jnp.float32) * sc,
    }

    out = jax.jit(spatial_proj_forward)(x, params)
    out = jax.block_until_ready(out)

    assert out.shape == (B, C, H, W), out.shape
    assert bool(jnp.all(jnp.isfinite(out)))

    ref = spatial_proj_reference(x, params)
    max_abs = float(jnp.max(jnp.abs(out - ref)))
    rel = max_abs / (float(jnp.max(jnp.abs(ref))) + 1e-6)
    # bf16 matmul operands + fc_1 folded into the weights -> small numeric drift only.
    assert max_abs < 0.25 and rel < 0.05, (max_abs, rel)

    print("KERNEL_OK")
</pallas_src>

<mosaic_0001>
module attributes {stable_mosaic.version = 11 : i64} {
  func.func @_spatial_proj_kernel(%arg0: i32, %arg1: memref<32x256xf32, #tpu.memory_space<vmem>>, %arg2: memref<32x32xbf16, #tpu.memory_space<vmem>>, %arg3: memref<32x32xbf16, #tpu.memory_space<vmem>>, %arg4: memref<32x32xbf16, #tpu.memory_space<vmem>>, %arg5: memref<32x1xf32, #tpu.memory_space<vmem>>, %arg6: memref<32x256xf32, #tpu.memory_space<vmem>>) attributes {dimension_semantics = [#tpu.dimension_semantics<parallel>], iteration_bounds = array<i64: 8>, scalar_prefetch = 0 : i64, scratch_operands = 0 : i64, tpu.core_type = #tpu.core_type<tc>, window_params = [{transform_indices = @transform_0, window_bounds = array<i64: 32, 256>}, {pipeline_mode = #tpu.pipeline_mode<synchronous>, transform_indices = @transform_1, window_bounds = array<i64: 32, 32>}, {pipeline_mode = #tpu.pipeline_mode<synchronous>, transform_indices = @transform_2, window_bounds = array<i64: 32, 32>}, {pipeline_mode = #tpu.pipeline_mode<synchronous>, transform_indices = @transform_3, window_bounds = array<i64: 32, 32>}, {pipeline_mode = #tpu.pipeline_mode<synchronous>, transform_indices = @transform_4, window_bounds = array<i64: 32, 1>}, {transform_indices = @transform_5, window_bounds = array<i64: 32, 256>}]} {
    %c0 = arith.constant 0 : index
    %c0_0 = arith.constant 0 : index
    %0 = vector.load %arg1[%c0, %c0_0] : memref<32x256xf32, #tpu.memory_space<vmem>>, vector<32x256xf32>
    %1 = tpu.iota {dimensions = array<i32: 1>} : vector<32x256xi32>
    %c16_i32 = arith.constant 16 : i32
    %c0_i32 = arith.constant 0 : i32
    %2 = arith.cmpi eq, %c16_i32, %c0_i32 : i32
    %c1_i32 = arith.constant 1 : i32
    %3 = arith.select %2, %c1_i32, %c16_i32 : i32
    %4 = vector.broadcast %3 : i32 to vector<32x256xi32>
    %5 = arith.remsi %1, %4 : vector<32x256xi32>
    %c0_i32_1 = arith.constant 0 : i32
    %6 = vector.broadcast %c0_i32_1 : i32 to vector<32x256xi32>
    %7 = arith.cmpi ne, %5, %6 : vector<32x256xi32>
    %c0_i32_2 = arith.constant 0 : i32
    %8 = vector.broadcast %c0_i32_2 : i32 to vector<32x256xi32>
    %9 = arith.cmpi slt, %5, %8 : vector<32x256xi32>
    %c0_i32_3 = arith.constant 0 : i32
    %10 = arith.cmpi slt, %3, %c0_i32_3 : i32
    %11 = vector.broadcast %10 : i1 to vector<32x256xi1>
    %12 = vector.broadcast %11 : vector<32x256xi1> to vector<32x256xi1>
    %13 = arith.xori %9, %12 : vector<32x256xi1>
    %14 = arith.andi %13, %7 : vector<32x256xi1>
    %15 = vector.broadcast %3 : i32 to vector<32x256xi32>
    %16 = arith.addi %5, %15 : vector<32x256xi32>
    %17 = arith.select %14, %16, %5 : vector<32x256xi1>, vector<32x256xi32>
    %18 = tpu.iota {dimensions = array<i32: 0>} : vector<32x256xi32>
    %c7_i32 = arith.constant 7 : i32
    %c0_i32_4 = arith.constant 0 : i32
    %19 = arith.cmpi eq, %c7_i32, %c0_i32_4 : i32
    %c1_i32_5 = arith.constant 1 : i32
    %20 = arith.select %19, %c1_i32_5, %c7_i32 : i32
    %21 = vector.broadcast %20 : i32 to vector<32x256xi32>
    %22 = arith.remsi %18, %21 : vector<32x256xi32>
    %c0_i32_6 = arith.constant 0 : i32
    %23 = vector.broadcast %c0_i32_6 : i32 to vector<32x256xi32>
    %24 = arith.cmpi ne, %22, %23 : vector<32x256xi32>
    %c0_i32_7 = arith.constant 0 : i32
    %25 = vector.broadcast %c0_i32_7 : i32 to vector<32x256xi32>
    %26 = arith.cmpi slt, %22, %25 : vector<32x256xi32>
    %c0_i32_8 = arith.constant 0 : i32
    %27 = arith.cmpi slt, %20, %c0_i32_8 : i32
    %28 = vector.broadcast %27 : i1 to vector<32x256xi1>
    %29 = vector.broadcast %28 : vector<32x256xi1> to vector<32x256xi1>
    %30 = arith.xori %26, %29 : vector<32x256xi1>
    %31 = arith.andi %30, %24 : vector<32x256xi1>
    %32 = vector.broadcast %20 : i32 to vector<32x256xi32>
    %33 = arith.addi %22, %32 : vector<32x256xi32>
    %34 = arith.select %31, %33, %22 : vector<32x256xi1>, vector<32x256xi32>
    %c16_i32_9 = arith.constant 16 : i32
    %35 = tpu.dynamic_rotate %0 by %c16_i32_9 dim 1 : vector<32x256xf32>, i32 -> vector<32x256xf32>
    %c1_i32_10 = arith.constant 1 : i32
    %36 = vector.broadcast %c1_i32_10 : i32 to vector<32x256xi32>
    %37 = arith.cmpi slt, %17, %36 : vector<32x256xi32>
    %c241_i32 = arith.constant 241 : i32
    %38 = tpu.dynamic_rotate %0 by %c241_i32 dim 1 : vector<32x256xf32>, i32 -> vector<32x256xf32>
    %c1_i32_11 = arith.constant 1 : i32
    %39 = tpu.dynamic_rotate %0 by %c1_i32_11 dim 1 : vector<32x256xf32>, i32 -> vector<32x256xf32>
    %40 = arith.select %37, %38, %39 : vector<32x256xi1>, vector<32x256xf32>
    %c1_i32_12 = arith.constant 1 : i32
    %41 = vector.broadcast %c1_i32_12 : i32 to vector<32x256xi32>
    %42 = arith.cmpi slt, %17, %41 : vector<32x256xi32>
    %c241_i32_13 = arith.constant 241 : i32
    %43 = tpu.dynamic_rotate %35 by %c241_i32_13 dim 1 : vector<32x256xf32>, i32 -> vector<32x256xf32>
    %c1_i32_14 = arith.constant 1 : i32
    %44 = tpu.dynamic_rotate %35 by %c1_i32_14 dim 1 : vector<32x256xf32>, i32 -> vector<32x256xf32>
    %45 = arith.select %42, %43, %44 : vector<32x256xi1>, vector<32x256xf32>
    %c16_i32_15 = arith.constant 16 : i32
    %46 = tpu.dynamic_rotate %40 by %c16_i32_15 dim 1 : vector<32x256xf32>, i32 -> vector<32x256xf32>
    %c0_i32_16 = arith.constant 0 : i32
    %47 = vector.broadcast %c0_i32_16 : i32 to vector<32x256xi32>
    %48 = arith.cmpi eq, %34, %47 : vector<32x256xi32>
    %cst = arith.constant 0.000000e+00 : f32
    %49 = vector.broadcast %cst : f32 to vector<32x256xf32>
    %50 = arith.select %48, %45, %49 : vector<32x256xi1>, vector<32x256xf32>
    %cst_17 = arith.constant 0.000000e+00 : f32
    %51 = vector.broadcast %cst_17 : f32 to vector<32x256xf32>
    %52 = arith.select %48, %46, %51 : vector<32x256xi1>, vector<32x256xf32>
    %c1_i32_18 = arith.constant 1 : i32
    %53 = vector.broadcast %c1_i32_18 : i32 to vector<32x256xi32>
    %54 = arith.cmpi eq, %34, %53 : vector<32x256xi32>
    %cst_19 = arith.constant 0.000000e+00 : f32
    %55 = vector.broadcast %cst_19 : f32 to vector<32x256xf32>
    %56 = arith.select %54, %35, %55 : vector<32x256xi1>, vector<32x256xf32>
    %cst_20 = arith.constant 0.000000e+00 : f32
    %57 = vector.broadcast %cst_20 : f32 to vector<32x256xf32>
    %58 = arith.select %54, %40, %57 : vector<32x256xi1>, vector<32x256xf32>
    %c15_i32 = arith.constant 15 : i32
    %59 = vector.broadcast %c15_i32 : i32 to vector<32x256xi32>
    %60 = arith.cmpi slt, %17, %59 : vector<32x256xi32>
    %c255_i32 = arith.constant 255 : i32
    %61 = tpu.dynamic_rotate %35 by %c255_i32 dim 1 : vector<32x256xf32>, i32 -> vector<32x256xf32>
    %c15_i32_21 = arith.constant 15 : i32
    %62 = tpu.dynamic_rotate %35 by %c15_i32_21 dim 1 : vector<32x256xf32>, i32 -> vector<32x256xf32>
    %63 = arith.select %60, %61, %62 : vector<32x256xi1>, vector<32x256xf32>
    %c240_i32 = arith.constant 240 : i32
    %64 = tpu.dynamic_rotate %40 by %c240_i32 dim 1 : vector<32x256xf32>, i32 -> vector<32x256xf32>
    %c2_i32 = arith.constant 2 : i32
    %65 = vector.broadcast %c2_i32 : i32 to vector<32x256xi32>
    %66 = arith.cmpi eq, %34, %65 : vector<32x256xi32>
    %cst_22 = arith.constant 0.000000e+00 : f32
    %67 = vector.broadcast %cst_22 : f32 to vector<32x256xf32>
    %68 = arith.select %66, %63, %67 : vector<32x256xi1>, vector<32x256xf32>
    %cst_23 = arith.constant 0.000000e+00 : f32
    %69 = vector.broadcast %cst_23 : f32 to vector<32x256xf32>
    %70 = arith.select %66, %64, %69 : vector<32x256xi1>, vector<32x256xf32>
    %c14_i32 = arith.constant 14 : i32
    %71 = vector.broadcast %c14_i32 : i32 to vector<32x256xi32>
    %72 = arith.cmpi slt, %17, %71 : vector<32x256xi32>
    %c254_i32 = arith.constant 254 : i32
    %73 = tpu.dynamic_rotate %35 by %c254_i32 dim 1 : vector<32x256xf32>, i32 -> vector<32x256xf32>
    %c14_i32_24 = arith.constant 14 : i32
    %74 = tpu.dynamic_rotate %35 by %c14_i32_24 dim 1 : vector<32x256xf32>, i32 -> vector<32x256xf32>
    %75 = arith.select %72, %73, %74 : vector<32x256xi1>, vector<32x256xf32>
    %c224_i32 = arith.constant 224 : i32
    %76 = tpu.dynamic_rotate %40 by %c224_i32 dim 1 : vector<32x256xf32>, i32 -> vector<32x256xf32>
    %c3_i32 = arith.constant 3 : i32
    %77 = vector.broadcast %c3_i32 : i32 to vector<32x256xi32>
    %78 = arith.cmpi eq, %34, %77 : vector<32x256xi32>
    %cst_25 = arith.constant 0.000000e+00 : f32
    %79 = vector.broadcast %cst_25 : f32 to vector<32x256xf32>
    %80 = arith.select %78, %75, %79 : vector<32x256xi1>, vector<32x256xf32>
    %cst_26 = arith.constant 0.000000e+00 : f32
    %81 = vector.broadcast %cst_26 : f32 to vector<32x256xf32>
    %82 = arith.select %78, %76, %81 : vector<32x256xi1>, vector<32x256xf32>
    %c13_i32 = arith.constant 13 : i32
    %83 = vector.broadcast %c13_i32 : i32 to vector<32x256xi32>
    %84 = arith.cmpi slt, %17, %83 : vector<32x256xi32>
    %c253_i32 = arith.constant 253 : i32
    %85 = tpu.dynamic_rotate %35 by %c253_i32 dim 1 : vector<32x256xf32>, i32 -> vector<32x256xf32>
    %c13_i32_27 = arith.constant 13 : i32
    %86 = tpu.dynamic_rotate %35 by %c13_i32_27 dim 1 : vector<32x256xf32>, i32 -> vector<32x256xf32>
    %87 = arith.select %84, %85, %86 : vector<32x256xi1>, vector<32x256xf32>
    %c208_i32 = arith.constant 208 : i32
    %88 = tpu.dynamic_rotate %40 by %c208_i32 dim 1 : vector<32x256xf32>, i32 -> vector<32x256xf32>
    %c4_i32 = arith.constant 4 : i32
    %89 = vector.broadcast %c4_i32 : i32 to vector<32x256xi32>
    %90 = arith.cmpi eq, %34, %89 : vector<32x256xi32>
    %cst_28 = arith.constant 0.000000e+00 : f32
    %91 = vector.broadcast %cst_28 : f32 to vector<32x256xf32>
    %92 = arith.select %90, %87, %91 : vector<32x256xi1>, vector<32x256xf32>
    %cst_29 = arith.constant 0.000000e+00 : f32
    %93 = vector.broadcast %cst_29 : f32 to vector<32x256xf32>
    %94 = arith.select %90, %88, %93 : vector<32x256xi1>, vector<32x256xf32>
    %c12_i32 = arith.constant 12 : i32
    %95 = vector.broadcast %c12_i32 : i32 to vector<32x256xi32>
    %96 = arith.cmpi slt, %17, %95 : vector<32x256xi32>
    %c252_i32 = arith.constant 252 : i32
    %97 = tpu.dynamic_rotate %35 by %c252_i32 dim 1 : vector<32x256xf32>, i32 -> vector<32x256xf32>
    %c12_i32_30 = arith.constant 12 : i32
    %98 = tpu.dynamic_rotate %35 by %c12_i32_30 dim 1 : vector<32x256xf32>, i32 -> vector<32x256xf32>
    %99 = arith.select %96, %97, %98 : vector<32x256xi1>, vector<32x256xf32>
    %c192_i32 = arith.constant 192 : i32
    %100 = tpu.dynamic_rotate %40 by %c192_i32 dim 1 : vector<32x256xf32>, i32 -> vector<32x256xf32>
    %c5_i32 = arith.constant 5 : i32
    %101 = vector.broadcast %c5_i32 : i32 to vector<32x256xi32>
    %102 = arith.cmpi eq, %34, %101 : vector<32x256xi32>
    %cst_31 = arith.constant 0.000000e+00 : f32
    %103 = vector.broadcast %cst_31 : f32 to vector<32x256xf32>
    %104 = arith.select %102, %99, %103 : vector<32x256xi1>, vector<32x256xf32>
    %cst_32 = arith.constant 0.000000e+00 : f32
    %105 = vector.broadcast %cst_32 : f32 to vector<32x256xf32>
    %106 = arith.select %102, %100, %105 : vector<32x256xi1>, vector<32x256xf32>
    %c11_i32 = arith.constant 11 : i32
    %107 = vector.broadcast %c11_i32 : i32 to vector<32x256xi32>
    %108 = arith.cmpi slt, %17, %107 : vector<32x256xi32>
    %c251_i32 = arith.constant 251 : i32
    %109 = tpu.dynamic_rotate %35 by %c251_i32 dim 1 : vector<32x256xf32>, i32 -> vector<32x256xf32>
    %c11_i32_33 = arith.constant 11 : i32
    %110 = tpu.dynamic_rotate %35 by %c11_i32_33 dim 1 : vector<32x256xf32>, i32 -> vector<32x256xf32>
    %111 = arith.select %108, %109, %110 : vector<32x256xi1>, vector<32x256xf32>
    %c176_i32 = arith.constant 176 : i32
    %112 = tpu.dynamic_rotate %40 by %c176_i32 dim 1 : vector<32x256xf32>, i32 -> vector<32x256xf32>
    %c6_i32 = arith.constant 6 : i32
    %113 = vector.broadcast %c6_i32 : i32 to vector<32x256xi32>
    %114 = arith.cmpi eq, %34, %113 : vector<32x256xi32>
    %cst_34 = arith.constant 0.000000e+00 : f32
    %115 = vector.broadcast %cst_34 : f32 to vector<32x256xf32>
    %116 = arith.select %114, %111, %115 : vector<32x256xi1>, vector<32x256xf32>
    %cst_35 = arith.constant 0.000000e+00 : f32
    %117 = vector.broadcast %cst_35 : f32 to vector<32x256xf32>
    %118 = arith.select %114, %112, %117 : vector<32x256xi1>, vector<32x256xf32>
    %119 = arith.addf %50, %56 : vector<32x256xf32>
    %120 = arith.addf %68, %80 : vector<32x256xf32>
    %121 = arith.addf %92, %104 : vector<32x256xf32>
    %122 = arith.addf %119, %120 : vector<32x256xf32>
    %123 = arith.addf %121, %116 : vector<32x256xf32>
    %124 = arith.addf %122, %123 : vector<32x256xf32>
    %125 = arith.addf %52, %58 : vector<32x256xf32>
    %126 = arith.addf %70, %82 : vector<32x256xf32>
    %127 = arith.addf %94, %106 : vector<32x256xf32>
    %128 = arith.addf %125, %126 : vector<32x256xf32>
    %129 = arith.addf %127, %118 : vector<32x256xf32>
    %130 = arith.addf %128, %129 : vector<32x256xf32>
    %c0_36 = arith.constant 0 : index
    %c0_37 = arith.constant 0 : index
    %131 = vector.load %arg2[%c0_36, %c0_37] : memref<32x32xbf16, #tpu.memory_space<vmem>>, vector<32x32xbf16>
    %132 = arith.truncf %124 : vector<32x256xf32> to vector<32x256xbf16>
    %cst_38 = arith.constant dense<0.000000e+00> : vector<32x256xf32>
    %133 = tpu.matmul %131, %132, %cst_38 {dimension_numbers = #tpu.dot_dimension_numbers<[1], [0], [0], [1], [0, 0, 1, 1], [], []>} : vector<32x32xbf16>, vector<32x256xbf16>, vector<32x256xf32> -> vector<32x256xf32>
    %c0_39 = arith.constant 0 : index
    %c0_40 = arith.constant 0 : index
    %134 = vector.load %arg3[%c0_39, %c0_40] : memref<32x32xbf16, #tpu.memory_space<vmem>>, vector<32x32xbf16>
    %135 = arith.truncf %45 : vector<32x256xf32> to vector<32x256xbf16>
    %cst_41 = arith.constant dense<0.000000e+00> : vector<32x256xf32>
    %136 = tpu.matmul %134, %135, %cst_41 {dimension_numbers = #tpu.dot_dimension_numbers<[1], [0], [0], [1], [0, 0, 1, 1], [], []>} : vector<32x32xbf16>, vector<32x256xbf16>, vector<32x256xf32> -> vector<32x256xf32>
    %137 = arith.addf %133, %136 : vector<32x256xf32>
    %c0_42 = arith.constant 0 : index
    %c0_43 = arith.constant 0 : index
    %138 = vector.load %arg4[%c0_42, %c0_43] : memref<32x32xbf16, #tpu.memory_space<vmem>>, vector<32x32xbf16>
    %139 = arith.truncf %130 : vector<32x256xf32> to vector<32x256xbf16>
    %cst_44 = arith.constant dense<0.000000e+00> : vector<32x256xf32>
    %140 = tpu.matmul %138, %139, %cst_44 {dimension_numbers = #tpu.dot_dimension_numbers<[1], [0], [0], [1], [0, 0, 1, 1], [], []>} : vector<32x32xbf16>, vector<32x256xbf16>, vector<32x256xf32> -> vector<32x256xf32>
    %141 = arith.addf %137, %140 : vector<32x256xf32>
    %c0_45 = arith.constant 0 : index
    %c0_46 = arith.constant 0 : index
    %142 = vector.load %arg5[%c0_45, %c0_46] : memref<32x1xf32, #tpu.memory_space<vmem>>, vector<32x1xf32>
    %143 = vector.broadcast %142 : vector<32x1xf32> to vector<32x256xf32>
    %144 = arith.addf %141, %143 : vector<32x256xf32>
    %c0_47 = arith.constant 0 : index
    %c0_48 = arith.constant 0 : index
    %145 = vector.load %arg6[%c0_47, %c0_48] : memref<32x256xf32, #tpu.memory_space<vmem>>, vector<32x256xf32>
    tpu.vector_store %arg6[%c0_47, %c0_48], %144 {strides = array<i32>} : memref<32x256xf32, #tpu.memory_space<vmem>>, vector<32x256xf32>,
    return
  }
  func.func @transform_0(%arg0: i32) -> (i32, i32) {
    %c0_i32 = arith.constant 0 : i32
    %c0_i32_0 = arith.constant 0 : i32
    return %arg0, %c0_i32 : i32, i32
  }
  func.func @transform_1(%arg0: i32) -> (i32, i32) {
    %c0_i32 = arith.constant 0 : i32
    %c0_i32_0 = arith.constant 0 : i32
    %c0_i32_1 = arith.constant 0 : i32
    return %c0_i32, %c0_i32_0 : i32, i32
  }
  func.func @transform_2(%arg0: i32) -> (i32, i32) {
    %c0_i32 = arith.constant 0 : i32
    %c0_i32_0 = arith.constant 0 : i32
    %c0_i32_1 = arith.constant 0 : i32
    return %c0_i32, %c0_i32_0 : i32, i32
  }
  func.func @transform_3(%arg0: i32) -> (i32, i32) {
    %c0_i32 = arith.constant 0 : i32
    %c0_i32_0 = arith.constant 0 : i32
    %c0_i32_1 = arith.constant 0 : i32
    return %c0_i32, %c0_i32_0 : i32, i32
  }
  func.func @transform_4(%arg0: i32) -> (i32, i32) {
    %c0_i32 = arith.constant 0 : i32
    %c0_i32_0 = arith.constant 0 : i32
    %c0_i32_1 = arith.constant 0 : i32
    return %c0_i32, %c0_i32_0 : i32, i32
  }
  func.func @transform_5(%arg0: i32) -> (i32, i32) {
    %c0_i32 = arith.constant 0 : i32
    %c0_i32_0 = arith.constant 0 : i32
    return %arg0, %c0_i32 : i32, i32
  }
}

</mosaic_0001>

<bundles_post_ra>
// kernel: spatial_proj_forward.1
= control target key start
LH: loop header
LB: loop body
LE: loop exit
PB: predicated region body
PF: predicated region fallthrough
CT: control target
= control target key end

     0   :  { %s1661_s18 = smov 0   ;;  %s3143_s0 = inlined_call_operand.vmem [shape: f32[256,256], index: 0, kind: input, shape index: {}]   ;;  %s3144_s1 = inlined_call_operand.vmem [shape: bf16[32,32], index: 1, kind: input, shape index: {}]   ;;  %s3145_s2 = inlined_call_operand.vmem [shape: bf16[32,32], index: 2, kind: input, shape index: {}]   ;;  %s3146_s3 = inlined_call_operand.vmem [shape: bf16[32,32], index: 3, kind: input, shape index: {}]   ;;  %s3147_s4 = inlined_call_operand.vmem [shape: f32[32,1], index: 4, kind: input, shape index: {}]   ;;  %s3148_s5 = inlined_call_operand.vmem [shape: f32[256,256], index: 5, kind: output, shape index: {}]  }
   0x1 LB: > { %s1514_s19 = sadd.s32 4294967295, %s1610_s18   ;;  %p1518_p0 = scmp.ge.s32.totalorder %s1610_s18, 1  ;;  %s1610_s18 = sphi %s1661_s18, %s15_s18  }
   0x2   : > { %p189_p1 = scmp.lt.s32.totalorder %s1610_s18, 9 }
   0x4   : > { %p190_p2 = pnand %p1518_p0, %p189_p1 }
   0x6   : > { %193 = sbr.rel (%p190_p2) target bundleno = 779 (0x30b), region = 40 }
   0xd   : > { %s1519_s20 = sshll.u32 %s1514_s19, 2  ;;  %v3149_v0 = vmov 0   ;;  %s1613_s25 = smov 16   ;;  %v242_v9 = vlaneseq }
   0xe   : > { %p220_p3 = scmp.lt.s32.totalorder %s1519_s20, 31  ;;  %1241 = vmatprep.mubr.bf16.mxu1 %v3149_v0  ;;  %1310 = vmatprep.mubr.bf16.mxu0 %v3149_v0  ;;  %s1614_s26 = smov 113  }
   0xf   : > { %1596 = vset.pattern.permute.xlu0 %v3149_v0  ;;  %1597 = vset.pattern.permute.xlu1 %v3149_v0  ;;  %s1615_s27 = smov 1   ;;  %v1706_v10 = vand.u32 127, %v242_v9  ;;  %s1616_s28 = smov 127   ;;  %v1826_v30 = vshrl.u32 %v242_v9, 7 }
  0x10   : > { %s3326_s20 = smov (!%p220_p3, %s1519_s20), 31  ;;  %s1617_s29 = smov 15  }
  0x11   : > { %s1539_s21 = sshll.u32 %s3326_s20, 4  ;;  %vm3157_vm0 = vcmp.lt.s32.totalorder %v1706_v10, 16  ;;  %s1618_s30 = smov 126   ;;  %v271_v31 = vadd.s32 8, %v1826_v30  ;;  %v1836_v33 = vmul.u32.u64.low 2454267026, %v1826_v30  ;;  %v1837_v34 = vmul.u32.u64.high 2454267026, %v1826_v30, %v1836_v33 }
  0x12   : > { %s224_s24 = scalar_lea.vmem %s3143_s0, %s1539_s21  ;;  %s1619_s6 = smov 14   ;;  %v244_v60 = vadd.s32 128, %v1706_v10  ;;  %vm3159_vm9 = vcmp.lt.s32.totalorder %v1706_v10, 113  ;;  %vm3158_vm13 = vcmp.lt.s32.totalorder %v1706_v10, 1 }
  0x13   : > { %v235_v1 = vld [vmem:[%s224_s24 + $0x8] sm:$0xff]  ;;  %v234_v2 = vld [vmem:[%s224_s24] sm:$0xff]  ;;  %v237_v3 = vld [vmem:[%s224_s24 + $0x18] sm:$0xff]  ;;  %s1620_s7 = smov 125   ;;  %s1621_s8 = smov 13  }
  0x14   : > { %358 = vrot.lane.b32.xlu1 %v235_v1, %s1613_s25  ;;  %350 = vrot.lane.b32.xlu0 %v234_v2, %s1613_s25  ;;  %v236_v4 = vld [vmem:[%s224_s24 + $0x10] sm:$0xff]  ;;  %v238_v6 = vld [vmem:[%s224_s24 + $0x20] sm:$0xff]  ;;  %s1622_s9 = smov 124   ;;  %s1623_s10 = smov 12   ;;  %v1845_v36 = vmul.u32.u64.low 2454267026, %v271_v31  ;;  %v1846_v37 = vmul.u32.u64.high 2454267026, %v271_v31, %v1845_v36 }
  0x15   : > { %v240_v5 = vld [vmem:[%s224_s24 + $0x30] sm:$0xff]  ;;  %v241_v7 = vld [vmem:[%s224_s24 + $0x38] sm:$0xff]  ;;  %v239_v8 = vld [vmem:[%s224_s24 + $0x28] sm:$0xff]  ;;  %s1624_s11 = smov 123   ;;  %s1625_s12 = smov 11  }
  0x16   : > { %vm280_vm1 = vc.u32 %v1836_v33, 2454267026  ;;  %vm294_vm2 = vc.u32 %v1845_v36, 2454267026  ;;  %s1626_s13 = smov 112   ;;  %s1627_s14 = smov 96  }
  0x17   : > { %v281_v40 = vsel %vm280_vm1, 1, %v3149_v0  ;;  %v295_v45 = vsel %vm294_vm2, 1, %v3149_v0  ;;  %s1628_s15 = smov 80   ;;  %s1629_s16 = smov 64  }
  0x18   : > { %360 = vrot.lane.b32.xlu1 %v237_v3, %s1613_s25  ;;  %352 = vrot.lane.b32.xlu0 %v236_v4, %s1613_s25  ;;  %v282_v44 = vadd.s32 %v1837_v34, %v281_v40  ;;  %v296_v48 = vadd.s32 %v1846_v37, %v295_v45  ;;  %s1630_s17 = smov 48   ;;  %s231_s19 = scalar_lea.vmem %s3148_s5, %s1539_s21 }
  0x1a   : > { %v283_v50 = vshrl.u32 %v282_v44, 2  ;;  %v297_v51 = vshrl.u32 %v296_v48, 2 }
  0x1c   : > { %356 = vrot.lane.b32.xlu1 %v240_v5, %s1613_s25  ;;  %354 = vrot.lane.b32.xlu0 %v238_v6, %s1613_s25  ;;  %v284_v53 = vmul.u32 7, %v283_v50  ;;  %v298_v55 = vmul.u32 7, %v297_v51 }
  0x1e   : > { %v285_v56 = vsub.s32 %v1826_v30, %v284_v53  ;;  %v299_v59 = vsub.s32 %v271_v31, %v298_v55 }
  0x20   : > { %364 = vrot.lane.b32.xlu1 %v241_v7, %s1613_s25  ;;  %362 = vrot.lane.b32.xlu0 %v239_v8, %s1613_s25  ;;  %vm330_vm3 = vcmp.ne.s32.totalorder %v285_v56, 0  ;;  %vm334_vm4 = vcmp.lt.s32.totalorder %v285_v56, 0  ;;  %v342_v63 = vadd.s32 7, %v285_v56  ;;  %vm331_vm5 = vcmp.ne.s32.totalorder %v299_v59, 0 }
  0x21   : > { %vm335_vm6 = vcmp.lt.s32.totalorder %v299_v59, 0  ;;  %vm338_vm7 = vmand %vm334_vm4, %vm330_vm3  ;;  %vm3171_vm4 = vcmp.lt.s32.totalorder %v1706_v10, 127 }
  0x22   : > { %vm339_vm8 = vmand %vm335_vm6, %vm331_vm5 }
  0x24   : > { %379 = vrot.lane.b32.xlu1 %v236_v4, %s1614_s26  ;;  %377 = vrot.lane.b32.xlu0 %v234_v2, %s1614_s26 }
  0x28   : > { %387 = vrot.lane.b32.xlu1 %v237_v3, %s1614_s26  ;;  %385 = vrot.lane.b32.xlu0 %v235_v1, %s1614_s26 }
  0x2c   : > { %404 = vrot.lane.b32.xlu1 %v236_v4, %s1615_s27  ;;  %402 = vrot.lane.b32.xlu0 %v234_v2, %s1615_s27  ;;  %v1913_v2 = vand.u32 15, %v1706_v10 }
  0x2e   : > { %vm3163_vm11 = vcmp.lt.s32.totalorder %v1913_v2, 1  ;;  %vm3167_vm5 = vcmp.lt.s32.totalorder %v1913_v2, 15 }
  0x30   : > { %412 = vrot.lane.b32.xlu1 %v237_v3, %s1615_s27  ;;  %410 = vrot.lane.b32.xlu0 %v235_v1, %s1615_s27  ;;  %v343_v1 = vadd.s32 7, %v299_v59  ;;  %v1915_v3 = vand.u32 15, %v244_v60 }
  0x32   : > { %vm3160_vm12 = vcmp.lt.s32.totalorder %v1915_v3, 1  ;;  %vm3168_vm6 = vcmp.lt.s32.totalorder %v1915_v3, 15 }
  0x34   : > { %383 = vrot.lane.b32.xlu1 %v240_v5, %s1614_s26  ;;  %381 = vrot.lane.b32.xlu0 %v238_v6, %s1614_s26 }
  0x38   : > { %391 = vrot.lane.b32.xlu1 %v241_v7, %s1614_s26  ;;  %389 = vrot.lane.b32.xlu0 %v239_v8, %s1614_s26 }
  0x3c   : > { %408 = vrot.lane.b32.xlu1 %v240_v5, %s1615_s27  ;;  %406 = vrot.lane.b32.xlu0 %v238_v6, %s1615_s27  ;;  %v1917_v6 = vsel %vm338_vm7, %v342_v63, %v285_v56  ;;  %vm3162_vm7 = vcmp.lt.s32.totalorder %v1706_v10, 15 }
  0x3d   : > { %vm3156_vm10 = vcmp.eq.s32.totalorder %v1917_v6, 1  ;;  %vm3154_vm14 = vcmp.eq.s32.totalorder %v1917_v6, 0 }
  0x40   : > { %416 = vrot.lane.b32.xlu1 %v241_v7, %s1615_s27  ;;  %414 = vrot.lane.b32.xlu0 %v239_v8, %s1615_s27  ;;  %v1924_v7 = vsel %vm339_vm8, %v343_v1, %v299_v59  ;;  %vm3173_vm8 = vcmp.eq.s32.totalorder %v1917_v6, 2 }
  0x41   : > { %vm3155_vm15 = vcmp.eq.s32.totalorder %v1924_v7, 1  ;;  %vm3153_vm1 = vcmp.eq.s32.totalorder %v1924_v7, 0 }
  0x86   : > { %v359_v11 = vpop.permute.xlu1 %358  ;;  %v351_v12 = vpop.permute.xlu0 %350 }
  0x87   : > { %v1711_v13 = vsel %vm3157_vm0, %v359_v11, %v351_v12  ;;  %v1717_v16 = vsel %vm3157_vm0, %v351_v12, %v359_v11 }
  0x88   : > { %435 = vrot.lane.b32.xlu0 %v1711_v13, %s1614_s26  ;;  %v539_v33 = vsel %vm3156_vm10, %v1711_v13, 0.0 }
  0x8a   : > { %v361_v14 = vpop.permute.xlu1 %360  ;;  %v353_v15 = vpop.permute.xlu0 %352 }
  0x8b   : > { %v1721_v17 = vsel %vm3157_vm0, %v361_v14, %v353_v15  ;;  %v1729_v18 = vsel %vm3157_vm0, %v353_v15, %v361_v14 }
  0x8c   : > { %443 = vrot.lane.b32.xlu0 %v1717_v16, %s1614_s26  ;;  %437 = vrot.lane.b32.xlu1 %v1721_v17, %s1614_s26  ;;  %v542_v50 = vsel %vm3155_vm15, %v1729_v18, 0.0  ;;  %v541_v53 = vsel %vm3155_vm15, %v1721_v17, 0.0  ;;  %vm3166_vm15 = vcmp.lt.s32.totalorder %v1915_v3, 14 }
  0x8e   : > { %v355_v19 = vpop.permute.xlu0 %354  ;;  %v357_v20 = vpop.permute.xlu1 %356 }
  0x90   : > { %459 = vrot.lane.b32.xlu0 %v1711_v13, %s1615_s27  ;;  %445 = vrot.lane.b32.xlu1 %v1729_v18, %s1614_s26 }
  0x92   : > { %v363_v21 = vpop.permute.xlu0 %362  ;;  %v365_v22 = vpop.permute.xlu1 %364 }
  0x93   : > { %v1850_v38 = vsel %vm3157_vm0, %v363_v21, %v355_v19  ;;  %v1863_v42 = vsel %vm3157_vm0, %v365_v22, %v357_v20  ;;  %v1867_v43 = vsel %vm3157_vm0, %v355_v19, %v363_v21  ;;  %v1879_v47 = vsel %vm3157_vm0, %v357_v20, %v365_v22 }
  0x94   : > { %467 = vrot.lane.b32.xlu0 %v1717_v16, %s1615_s27  ;;  %461 = vrot.lane.b32.xlu1 %v1721_v17, %s1615_s27  ;;  %v540_v22 = vsel %vm3156_vm10, %v1717_v16, 0.0  ;;  %vm3170_vm10 = vcmp.eq.s32.totalorder %v1917_v6, 3  ;;  %vm3169_vm0 = vcmp.eq.s32.totalorder %v1924_v7, 3 }
  0x96   : > { %v1795_v23 = vpop.permute.xlu0 %377  ;;  %v1801_v24 = vpop.permute.xlu1 %379 }
  0x98   : > { %557 = vrot.lane.b32.xlu0 %v1711_v13, %s1616_s28  ;;  %469 = vrot.lane.b32.xlu1 %v1729_v18, %s1615_s27 }
  0x9a   : > { %v1803_v25 = vpop.permute.xlu0 %385  ;;  %v1809_v26 = vpop.permute.xlu1 %387 }
  0x9c   : > { %565 = vrot.lane.b32.xlu0 %v1717_v16, %s1616_s28  ;;  %559 = vrot.lane.b32.xlu1 %v1721_v17, %s1616_s28 }
  0x9e   : > { %v1815_v27 = vpop.permute.xlu0 %402  ;;  %v1817_v28 = vpop.permute.xlu1 %404 }
  0xa0   : > { %582 = vrot.lane.b32.xlu0 %v1711_v13, %s1617_s29  ;;  %567 = vrot.lane.b32.xlu1 %v1729_v18, %s1616_s28 }
  0xa2   : > { %v1823_v29 = vpop.permute.xlu0 %410  ;;  %v1833_v32 = vpop.permute.xlu1 %412 }
  0xa4   : > { %590 = vrot.lane.b32.xlu0 %v1717_v16, %s1617_s29  ;;  %584 = vrot.lane.b32.xlu1 %v1721_v17, %s1617_s29 }
  0xa6   : > { %v1839_v35 = vpop.permute.xlu0 %381  ;;  %v1852_v39 = vpop.permute.xlu1 %383 }
  0xa8   : > { %662 = vrot.lane.b32.xlu0 %v1711_v13, %s1618_s30  ;;  %592 = vrot.lane.b32.xlu1 %v1729_v18, %s1617_s29 }
  0xaa   : > { %v1859_v41 = vpop.permute.xlu0 %389  ;;  %v1875_v46 = vpop.permute.xlu1 %391 }
  0xac   : > { %670 = vrot.lane.b32.xlu0 %v1717_v16, %s1618_s30  ;;  %664 = vrot.lane.b32.xlu1 %v1721_v17, %s1618_s30 }
  0xae   : > { %v1882_v49 = vpop.permute.xlu0 %406  ;;  %v1888_v52 = vpop.permute.xlu1 %408 }
  0xaf   : > { %3194 = vst [vmem:[#allocation2_spill] sm:$0xff] %v1888_v52  ;;  %v420_v52 = vsel %vm3158_vm13, %v1817_v28, %v1833_v32 }
  0xb0   : > { %687 = vrot.lane.b32.xlu0 %v1711_v13, %s1619_s6  ;;  %672 = vrot.lane.b32.xlu1 %v1729_v18, %s1618_s30 }
  0xb2   : > { %v1894_v54 = vpop.permute.xlu0 %414  ;;  %v1901_v57 = vpop.permute.xlu1 %416 }
  0xb3   : > { %3195 = vst [vmem:[#allocation3_spill] sm:$0xff] %v1901_v57 }
  0xb4   : > { %695 = vrot.lane.b32.xlu0 %v1717_v16, %s1619_s6  ;;  %689 = vrot.lane.b32.xlu1 %v1721_v17, %s1619_s6 }
  0xb8   : > { %767 = vrot.lane.b32.xlu0 %v1711_v13, %s1620_s7  ;;  %697 = vrot.lane.b32.xlu1 %v1729_v18, %s1619_s6 }
  0xbc   : > { %775 = vrot.lane.b32.xlu0 %v1717_v16, %s1620_s7  ;;  %769 = vrot.lane.b32.xlu1 %v1721_v17, %s1620_s7 }
  0xc0   : > { %792 = vrot.lane.b32.xlu0 %v1711_v13, %s1621_s8  ;;  %777 = vrot.lane.b32.xlu1 %v1729_v18, %s1620_s7 }
  0xc4   : > { %800 = vrot.lane.b32.xlu0 %v1717_v16, %s1621_s8  ;;  %794 = vrot.lane.b32.xlu1 %v1721_v17, %s1621_s8 }
  0xc8   : > { %872 = vrot.lane.b32.xlu0 %v1711_v13, %s1622_s9  ;;  %802 = vrot.lane.b32.xlu1 %v1729_v18, %s1621_s8 }
  0xcc   : > { %880 = vrot.lane.b32.xlu0 %v1717_v16, %s1622_s9  ;;  %874 = vrot.lane.b32.xlu1 %v1721_v17, %s1622_s9 }
  0xd0   : > { %897 = vrot.lane.b32.xlu0 %v1711_v13, %s1623_s10  ;;  %882 = vrot.lane.b32.xlu1 %v1729_v18, %s1622_s9 }
  0xd4   : > { %905 = vrot.lane.b32.xlu0 %v1717_v16, %s1623_s10  ;;  %899 = vrot.lane.b32.xlu1 %v1721_v17, %s1623_s10 }
  0xd8   : > { %977 = vrot.lane.b32.xlu0 %v1711_v13, %s1624_s11  ;;  %907 = vrot.lane.b32.xlu1 %v1729_v18, %s1623_s10 }
  0xdc   : > { %985 = vrot.lane.b32.xlu0 %v1717_v16, %s1624_s11  ;;  %979 = vrot.lane.b32.xlu1 %v1721_v17, %s1624_s11 }
  0xe0   : > { %1002 = vrot.lane.b32.xlu0 %v1711_v13, %s1625_s12  ;;  %987 = vrot.lane.b32.xlu1 %v1729_v18, %s1624_s11 }
  0xe4   : > { %1010 = vrot.lane.b32.xlu0 %v1717_v16, %s1625_s12  ;;  %1004 = vrot.lane.b32.xlu1 %v1721_v17, %s1625_s12 }
  0xe8   : > { %1012 = vrot.lane.b32.xlu1 %v1729_v18, %s1625_s12  ;;  %439 = vrot.lane.b32.xlu0 %v1850_v38, %s1614_s26 }
  0xec   : > { %441 = vrot.lane.b32.xlu1 %v1863_v42, %s1614_s26  ;;  %447 = vrot.lane.b32.xlu0 %v1867_v43, %s1614_s26 }
  0xf0   : > { %449 = vrot.lane.b32.xlu1 %v1879_v47, %s1614_s26  ;;  %463 = vrot.lane.b32.xlu0 %v1850_v38, %s1615_s27 }
  0xf4   : > { %465 = vrot.lane.b32.xlu1 %v1863_v42, %s1615_s27  ;;  %471 = vrot.lane.b32.xlu0 %v1867_v43, %s1615_s27 }
  0xf8   : > { %473 = vrot.lane.b32.xlu1 %v1879_v47, %s1615_s27  ;;  %561 = vrot.lane.b32.xlu0 %v1850_v38, %s1616_s28 }
  0xfa   : > { %v436_v58 = vpop.permute.xlu0 %435 }
  0xfc   : > { %563 = vrot.lane.b32.xlu1 %v1863_v42, %s1616_s28  ;;  %569 = vrot.lane.b32.xlu0 %v1867_v43, %s1616_s28 }
  0xfe   : > { %v438_v61 = vpop.permute.xlu1 %437  ;;  %v444_v62 = vpop.permute.xlu0 %443 }
  0xff   : > { %v451_v11 = vsel %vm3159_vm9, %v436_v58, %v444_v62  ;;  %v455_v14 = vsel %vm3159_vm9, %v444_v62, %v436_v58 }
 0x100   : > { %571 = vrot.lane.b32.xlu1 %v1879_v47, %s1616_s28  ;;  %586 = vrot.lane.b32.xlu0 %v1850_v38, %s1617_s29 }
 0x102   : > { %v446_v4 = vpop.permute.xlu1 %445  ;;  %v460_v5 = vpop.permute.xlu0 %459 }
 0x103   : > { %v452_v44 = vsel %vm3159_vm9, %v438_v61, %v446_v4  ;;  %v456_v45 = vsel %vm3159_vm9, %v446_v4, %v438_v61 }
 0x104   : > { %588 = vrot.lane.b32.xlu1 %v1863_v42, %s1617_s29  ;;  %594 = vrot.lane.b32.xlu0 %v1867_v43, %s1617_s29 }
 0x106   : > { %v462_v8 = vpop.permute.xlu1 %461  ;;  %v468_v9 = vpop.permute.xlu0 %467 }
 0x107   : > { %v479_v12 = vsel %vm3158_vm13, %v468_v9, %v460_v5  ;;  %v475_v15 = vsel %vm3158_vm13, %v460_v5, %v468_v9 }
 0x108   : > { %596 = vrot.lane.b32.xlu1 %v1879_v47, %s1617_s29  ;;  %666 = vrot.lane.b32.xlu0 %v1850_v38, %s1618_s30  ;;  %v484_v19 = vsel %vm3160_vm12, %v455_v14, %v475_v15  ;;  %v483_v20 = vsel %vm3163_vm11, %v451_v11, %v479_v12  ;;  %v272_v15 = vadd.s32 16, %v1826_v30 }
 0x109   : > { %v520_v21 = vsel %vm3154_vm14, %v484_v19, 0.0  ;;  %v519_v31 = vsel %vm3154_vm14, %v483_v20, 0.0  ;;  %vm3165_vm14 = vcmp.lt.s32.totalorder %v1913_v2, 14 }
 0x10a   : > { %v470_v34 = vpop.permute.xlu1 %469  ;;  %v1958_v36 = vpop.permute.xlu0 %557  ;;  %v1961_v37 = vadd.f32 %v540_v22, %v520_v21  ;;  %v1963_v40 = vadd.f32 %v539_v33, %v519_v31  ;;  %v2053_v22 = vmul.u32.u64.low 2454267026, %v272_v15  ;;  %v2054_v31 = vmul.u32.u64.high 2454267026, %v272_v15, %v2053_v22 }
 0x10b   : > { %v480_v16 = vsel %vm3158_vm13, %v470_v34, %v462_v8  ;;  %v476_v13 = vsel %vm3158_vm13, %v462_v8, %v470_v34 }
 0x10c   : > { %668 = vrot.lane.b32.xlu1 %v1863_v42, %s1618_s30  ;;  %674 = vrot.lane.b32.xlu0 %v1867_v43, %s1618_s30  ;;  %v486_v48 = vsel %vm3160_vm12, %v456_v45, %v476_v13  ;;  %v485_v51 = vsel %vm3163_vm11, %v452_v44, %v480_v16  ;;  %vm308_vm2 = vc.u32 %v2053_v22, 2454267026 }
 0x10d   : > { %v522_v55 = vsel %vm3153_vm1, %v486_v48, 0.0  ;;  %v1189_v56 = vpack.c.bf16 %v486_v48, %v484_v19  ;;  %v521_v58 = vsel %vm3153_vm1, %v485_v51, 0.0  ;;  %v1188_v59 = vpack.c.bf16 %v485_v51, %v483_v20 }
 0x10e   : > { %v1991_v60 = vpop.permute.xlu1 %559  ;;  %v1993_v61 = vpop.permute.xlu0 %565  ;;  %v1995_v18 = vadd.f32 %v542_v50, %v522_v55  ;;  %v1997_v62 = vadd.f32 %v541_v53, %v521_v58  ;;  %v273_v19 = vadd.s32 24, %v1826_v30  ;;  %v309_v13 = vsel %vm308_vm2, 1, %v3149_v0 }
 0x10f   : > { %1209 = vmatprep.subr.bf16.mxu1 %v1189_v56  ;;  %v310_v53 = vadd.s32 %v2054_v31, %v309_v13  ;;  %vm3172_vm2 = vcmp.eq.s32.totalorder %v1924_v7, 2  ;;  %vm3161_vm1 = vcmp.lt.s32.totalorder %v1706_v10, 14 }
 0x110   : > { %676 = vrot.lane.b32.xlu1 %v1879_v47, %s1618_s30  ;;  %691 = vrot.lane.b32.xlu0 %v1850_v38, %s1619_s6  ;;  %v2056_v33 = vmul.u32.u64.low 2454267026, %v273_v19  ;;  %v2057_v34 = vmul.u32.u64.high 2454267026, %v273_v19, %v2056_v33 }
 0x111   : > { %1210 = vmatpush1.bf16.msra.mxu1 %v1188_v59  ;;  %v311_v59 = vshrl.u32 %v310_v53, 2 }
 0x112   : > { %v2003_v17 = vpop.permute.xlu1 %567  ;;  %v2005_v63 = vpop.permute.xlu0 %582  ;;  %vm322_vm3 = vc.u32 %v2056_v33, 2454267026 }
 0x113   : > { %v323_v48 = vsel %vm322_vm3, 1, %v3149_v0  ;;  %vm3164_vm3 = vcmp.lt.s32.totalorder %v1706_v10, 126 }
 0x114   : > { %693 = vrot.lane.b32.xlu1 %v1863_v42, %s1619_s6  ;;  %699 = vrot.lane.b32.xlu0 %v1867_v43, %s1619_s6  ;;  %v324_v55 = vadd.s32 %v2057_v34, %v323_v48  ;;  %v312_v34 = vmul.u32 7, %v311_v59  ;;  %v395_v48 = vsel %vm3159_vm9, %v1801_v24, %v1809_v26  ;;  %v399_v59 = vsel %vm3159_vm9, %v1809_v26, %v1801_v24 }
 0x115   : > { %v398_v24 = vsel %vm3159_vm9, %v1803_v25, %v1795_v23  ;;  %v419_v26 = vsel %vm3158_vm13, %v1815_v27, %v1823_v29 }
 0x116   : > { %v2011_v1 = vpop.permute.xlu1 %584  ;;  %v2013_v4 = vpop.permute.xlu0 %590  ;;  %v325_v22 = vshrl.u32 %v324_v55, 2  ;;  %v2111_v0 = vsub.s32 %v272_v15, %v312_v34  ;;  %v424_v15 = vsel %vm3158_vm13, %v1833_v32, %v1817_v28  ;;  %v2173_v32 = vsel %vm3160_vm12, %v398_v24, %v419_v26 }
 0x117   : > { %v599_v34 = vsel %vm3162_vm7, %v2005_v63, %v2013_v4 }
 0x118   : > { %701 = vrot.lane.b32.xlu1 %v1879_v47, %s1619_s6  ;;  %771 = vrot.lane.b32.xlu0 %v1850_v38, %s1620_s7  ;;  %v326_v13 = vmul.u32 7, %v325_v22  ;;  %v394_v22 = vsel %vm3159_vm9, %v1795_v23, %v1803_v25  ;;  %v2153_v23 = vsel %vm3163_vm11, %v395_v48, %v424_v15  ;;  %v2157_v25 = vsel %vm3160_vm12, %v399_v59, %v420_v52 }
 0x119   : > { %vm3177_vm9 = vcmp.lt.s32.totalorder %v1706_v10, 13  ;;  %v574_v52 = vsel %vm3171_vm4, %v1958_v36, %v1993_v61  ;;  %v603_v59 = vsel %vm3162_vm7, %v2013_v4, %v2005_v63  ;;  %vm913_vm12 = vcmp.lt.s32.totalorder %v1706_v10, 12 }
 0x11a   : > { %v2019_v5 = vpop.permute.xlu1 %592  ;;  %v2021_v8 = vpop.permute.xlu0 %662  ;;  %v2113_v57 = vsub.s32 %v273_v19, %v326_v13  ;;  %v423_v19 = vsel %vm3158_vm13, %v1823_v29, %v1815_v27  ;;  %vm783_vm13 = vcmp.lt.s32.totalorder %v1706_v10, 125 }
 0x11b   : > { %v2169_v29 = vsel %vm3163_vm11, %v394_v22, %v423_v19  ;;  %v600_v22 = vsel %vm3162_vm7, %v2011_v1, %v2019_v5  ;;  %v604_v63 = vsel %vm3162_vm7, %v2019_v5, %v2011_v1  ;;  %vm3175_vm7 = vcmp.lt.s32.totalorder %v1913_v2, 12 }
 0x11c   : > { %773 = vrot.lane.b32.xlu1 %v1863_v42, %s1620_s7  ;;  %779 = vrot.lane.b32.xlu0 %v1867_v43, %s1620_s7  ;;  %vm3174_vm11 = vcmp.lt.s32.totalorder %v1915_v3, 12  ;;  %v579_v19 = vsel %vm3171_vm4, %v2003_v17, %v1991_v60 }
 0x11e   : > { %v2027_v9 = vpop.permute.xlu1 %664  ;;  %v2029_v11 = vpop.permute.xlu0 %670 }
 0x11f   : > { %v679_v4 = vsel %vm3164_vm3, %v2021_v8, %v2029_v11  ;;  %v683_v26 = vsel %vm3164_vm3, %v2029_v11, %v2021_v8  ;;  %v578_v8 = vsel %vm3171_vm4, %v1993_v61, %v1958_v36 }
 0x120   : > { %781 = vrot.lane.b32.xlu1 %v1879_v47, %s1620_s7  ;;  %796 = vrot.lane.b32.xlu0 %v1850_v38, %s1621_s8  ;;  %v608_v36 = vsel %vm3168_vm6, %v578_v8, %v599_v34 }
 0x122   : > { %v2035_v12 = vpop.permute.xlu1 %672  ;;  %v2037_v14 = vpop.permute.xlu0 %687 }
 0x123   : > { %v684_v1 = vsel %vm3164_vm3, %v2035_v12, %v2027_v9 }
 0x124   : > { %798 = vrot.lane.b32.xlu1 %v1863_v42, %s1621_s8  ;;  %804 = vrot.lane.b32.xlu0 %v1867_v43, %s1621_s8 }
 0x126   : > { %v2045_v20 = vpop.permute.xlu1 %689  ;;  %v2047_v21 = vpop.permute.xlu0 %695 }
 0x127   : > { %v704_v13 = vsel %vm3161_vm1, %v2037_v14, %v2047_v21  ;;  %v708_v48 = vsel %vm3161_vm1, %v2047_v21, %v2037_v14 }
 0x128   : > { %806 = vrot.lane.b32.xlu1 %v1879_v47, %s1621_s8  ;;  %876 = vrot.lane.b32.xlu0 %v1850_v38, %s1622_s9  ;;  %v712_v5 = vsel %vm3165_vm14, %v679_v4, %v708_v48 }
 0x12a   : > { %v2059_v44 = vpop.permute.xlu1 %697  ;;  %v2061_v16 = vpop.permute.xlu0 %767 }
 0x12b   : > { %v705_v15 = vsel %vm3161_vm1, %v2045_v20, %v2059_v44  ;;  %v709_v14 = vsel %vm3161_vm1, %v2059_v44, %v2045_v20  ;;  %v680_v20 = vsel %vm3164_vm3, %v2027_v9, %v2035_v12  ;;  %vm3176_vm1 = vcmp.lt.s32.totalorder %v1706_v10, 124 }
 0x12c   : > { %878 = vrot.lane.b32.xlu1 %v1863_v42, %s1622_s9  ;;  %884 = vrot.lane.b32.xlu0 %v1867_v43, %s1622_s9  ;;  %v713_v44 = vsel %vm3166_vm15, %v683_v26, %v704_v13  ;;  %v575_v9 = vsel %vm3171_vm4, %v1991_v60, %v2003_v17  ;;  %v714_v11 = vsel %vm3165_vm14, %v680_v20, %v709_v14  ;;  %vm766_vm3 = vcmp.lt.s32.totalorder %v1915_v3, 13 }
 0x12d   : > { %v715_v12 = vsel %vm3166_vm15, %v684_v1, %v705_v15  ;;  %v607_v13 = vsel %vm3167_vm5, %v574_v52, %v603_v59  ;;  %v609_v61 = vsel %vm3167_vm5, %v575_v9, %v604_v63  ;;  %vm3181_vm14 = vcmp.eq.s32.totalorder %v1917_v6, 4 }
 0x12e   : > { %v2067_v30 = vpop.permute.xlu1 %769  ;;  %v2069_v45 = vpop.permute.xlu0 %775  ;;  %v610_v14 = vsel %vm3168_vm6, %v579_v19, %v600_v22  ;;  %v749_v60 = vsel %vm3170_vm10, %v712_v5, 0.0  ;;  %v750_v17 = vsel %vm3170_vm10, %v713_v44, 0.0  ;;  %vm3186_vm15 = vcmp.eq.s32.totalorder %v1917_v6, 5 }
 0x12f   : > { %v751_v52 = vsel %vm3169_vm0, %v714_v11, 0.0  ;;  %v752_v34 = vsel %vm3169_vm0, %v715_v12, 0.0  ;;  %vm993_vm6 = vcmp.lt.s32.totalorder %v1706_v10, 123  ;;  %v644_v59 = vsel %vm3173_vm8, %v607_v13, 0.0 }
 0x130   : > { %886 = vrot.lane.b32.xlu1 %v1879_v47, %s1622_s9  ;;  %901 = vrot.lane.b32.xlu0 %v1850_v38, %s1623_s10  ;;  %v645_v22 = vsel %vm3173_vm8, %v608_v36, 0.0  ;;  %v646_v63 = vsel %vm3172_vm2, %v609_v61, 0.0  ;;  %vm3179_vm0 = vcmp.eq.s32.totalorder %v1924_v7, 4  ;;  %vm975_vm10 = vcmp.lt.s32.totalorder %v1913_v2, 11 }
 0x131   : > { %vm3187_vm4 = vcmp.lt.s32.totalorder %v1915_v3, 11  ;;  %vm1018_vm5 = vcmp.lt.s32.totalorder %v1706_v10, 11  ;;  %v647_v4 = vsel %vm3172_vm2, %v610_v14, 0.0  ;;  %v2311_v5 = vadd.f32 %v750_v17, %v645_v22 }
 0x132   : > { %v2077_v50 = vpop.permute.xlu1 %777  ;;  %v2079_v51 = vpop.permute.xlu0 %792  ;;  %v2313_v44 = vadd.f32 %v749_v60, %v644_v59  ;;  %v784_v8 = vsel %vm783_vm13, %v2061_v16, %v2069_v45  ;;  %v2322_v11 = vadd.f32 %v752_v34, %v647_v4  ;;  %v2324_v12 = vadd.f32 %v751_v52, %v646_v63 }
 0x133   : > { %vm3180_vm2 = vcmp.eq.s32.totalorder %v1917_v6, 6  ;;  %vm3196_vm8 = vcmp.lt.s32.totalorder %v1913_v2, 13  ;;  %v788_v52 = vsel %vm783_vm13, %v2069_v45, %v2061_v16 }
 0x134   : > { %903 = vrot.lane.b32.xlu1 %v1863_v42, %s1623_s10  ;;  %909 = vrot.lane.b32.xlu0 %v1867_v43, %s1623_s10 }
 0x136   : > { %v2087_v56 = vpop.permute.xlu1 %794  ;;  %v2089_v58 = vpop.permute.xlu0 %800 }
 0x137   : > { %v813_v26 = vsel %vm3177_vm9, %v2089_v58, %v2079_v51 }
 0x138   : > { %911 = vrot.lane.b32.xlu1 %v1879_v47, %s1623_s10  ;;  %981 = vrot.lane.b32.xlu0 %v1850_v38, %s1624_s11 }
 0x13a   : > { %v2095_v31 = vpop.permute.xlu1 %802  ;;  %v2097_v33 = vpop.permute.xlu0 %872 }
 0x13b   : > { %v814_v61 = vsel %vm3177_vm9, %v2095_v31, %v2087_v56 }
 0x13c   : > { %983 = vrot.lane.b32.xlu1 %v1863_v42, %s1624_s11  ;;  %989 = vrot.lane.b32.xlu0 %v1867_v43, %s1624_s11 }
 0x13e   : > { %v2107_v53 = vpop.permute.xlu1 %874  ;;  %v2109_v55 = vpop.permute.xlu0 %880 }
 0x140   : > { %991 = vrot.lane.b32.xlu1 %v1879_v47, %s1624_s11  ;;  %1006 = vrot.lane.b32.xlu0 %v1850_v38, %s1625_s12 }
 0x142   : > { %v2163_v27 = vpop.permute.xlu1 %882  ;;  %v2165_v28 = vpop.permute.xlu0 %897 }
 0x144   : > { %1008 = vrot.lane.b32.xlu1 %v1863_v42, %s1625_s12  ;;  %1014 = vrot.lane.b32.xlu0 %v1867_v43, %s1625_s12 }
 0x146   : > { %v900_v21 = vpop.permute.xlu1 %899  ;;  %v906_v24 = vpop.permute.xlu0 %905 }
 0x147   : > { %v914_v9 = vsel %vm913_vm12, %v2165_v28, %v906_v24  ;;  %v918_v19 = vsel %vm913_vm12, %v906_v24, %v2165_v28  ;;  %v809_v28 = vsel %vm3177_vm9, %v2079_v51, %v2089_v58  ;;  %v817_v24 = vsel %vm3196_vm8, %v784_v8, %v813_v26 }
 0x148   : > { %1016 = vrot.lane.b32.xlu1 %v1879_v47, %s1625_s12  ;;  %491 = vrot.lane.b32.xlu0 %v2169_v29, %s1613_s25  ;;  %v893_v51 = vsel %vm3176_vm1, %v2109_v55, %v2097_v33  ;;  %v890_v58 = vsel %vm3176_vm1, %v2107_v53, %v2163_v27  ;;  %vm3178_vm8 = vcmp.eq.s32.totalorder %v1924_v7, 6  ;;  %v818_v16 = vsel %vm766_vm3, %v788_v52, %v809_v28 }
 0x149   : > { %v923_v17 = vsel %vm3174_vm11, %v893_v51, %v914_v9  ;;  %v854_v45 = vsel %vm3181_vm14, %v817_v24, 0.0 }
 0x14a   : > { %v908_v48 = vpop.permute.xlu1 %907  ;;  %v2274_v15 = vpop.permute.xlu0 %977  ;;  %v960_v59 = vsel %vm3186_vm15, %v923_v17, 0.0 }
 0x14b   : > { %v915_v13 = vsel %vm913_vm12, %v900_v21, %v908_v48  ;;  %v919_v36 = vsel %vm913_vm12, %v908_v48, %v900_v21  ;;  %v810_v21 = vsel %vm3177_vm9, %v2087_v56, %v2095_v31  ;;  %v889_v48 = vsel %vm3176_vm1, %v2097_v33, %v2109_v55 }
 0x14c   : > { %493 = vrot.lane.b32.xlu1 %v2153_v23, %s1613_s25  ;;  %499 = vrot.lane.b32.xlu0 %v2173_v32, %s1613_s25  ;;  %v894_v56 = vsel %vm3176_vm1, %v2163_v27, %v2107_v53  ;;  %v922_v60 = vsel %vm3175_vm7, %v889_v48, %v918_v19  ;;  %v924_v33 = vsel %vm3175_vm7, %v890_v58, %v919_v36  ;;  %vm332_vm7 = vcmp.ne.s32.totalorder %v2111_v0, 0 }
 0x14d   : > { %v925_v55 = vsel %vm3174_vm11, %v894_v56, %v915_v13  ;;  %v785_v53 = vsel %vm783_vm13, %v2067_v30, %v2077_v50  ;;  %v789_v27 = vsel %vm783_vm13, %v2077_v50, %v2067_v30  ;;  %vm3197_vm11 = vcmp.lt.s32.totalorder %v1913_v2, 13 }
 0x14e   : > { %v2309_v20 = vpop.permute.xlu1 %979  ;;  %v986_v1 = vpop.permute.xlu0 %985  ;;  %v819_v34 = vsel %vm3197_vm11, %v785_v53, %v814_v61  ;;  %v820_v30 = vsel %vm766_vm3, %v789_v27, %v810_v21  ;;  %v959_v50 = vsel %vm3186_vm15, %v922_v60, 0.0  ;;  %vm3198_vm1 = vcmp.eq.s32.totalorder %v1924_v7, 5 }
 0x14f   : > { %v961_v22 = vsel %vm3198_vm1, %v924_v33, 0.0  ;;  %vm3199_vm9 = vmmov %vm3198_vm1  ;;  %v994_v8 = vsel %vm993_vm6, %v2274_v15, %v986_v1  ;;  %v998_v9 = vsel %vm993_vm6, %v986_v1, %v2274_v15  ;;  %v855_v36 = vsel %vm3181_vm14, %v818_v16, 0.0 }
 0x150   : > { %501 = vrot.lane.b32.xlu1 %v2157_v25, %s1613_s25  ;;  %615 = vrot.lane.b32.xlu0 %v2169_v29, %s1626_s13  ;;  %v962_v63 = vsel %vm3199_vm9, %v925_v55, 0.0  ;;  %v856_v28 = vsel %vm3179_vm0, %v819_v34, 0.0  ;;  %v857_v15 = vsel %vm3179_vm0, %v820_v30, 0.0  ;;  %v1097_v61 = vadd.f32 %v960_v59, %v855_v36 }
 0x151   : > { %v1096_v60 = vadd.f32 %v959_v50, %v854_v45  ;;  %v1098_v17 = vadd.f32 %v961_v22, %v856_v28  ;;  %vm336_vm9 = vcmp.lt.s32.totalorder %v2111_v0, 0  ;;  %v1105_v45 = vadd.f32 %v2311_v5, %v1961_v37 }
 0x152   : > { %v988_v31 = vpop.permute.xlu1 %987  ;;  %v1003_v14 = vpop.permute.xlu0 %1002  ;;  %v1104_v30 = vadd.f32 %v2313_v44, %v1963_v40  ;;  %v1107_v22 = vadd.f32 %v2322_v11, %v1995_v18  ;;  %vm333_vm11 = vcmp.ne.s32.totalorder %v2113_v57, 0  ;;  %vm337_vm1 = vcmp.lt.s32.totalorder %v2113_v57, 0 }
 0x153   : > { %v995_v51 = vsel %vm993_vm6, %v2309_v20, %v988_v31  ;;  %v999_v33 = vsel %vm993_vm6, %v988_v31, %v2309_v20  ;;  %vm341_vm0 = vmand %vm337_vm1, %vm333_vm11  ;;  %vm3202_vm1 = vcmp.lt.s32.totalorder %v1706_v10, 1  ;;  %vm3205_vm14 = vcmp.lt.s32.totalorder %v1915_v3, 1 }
 0x154   : > { %617 = vrot.lane.b32.xlu1 %v2153_v23, %s1626_s13  ;;  %623 = vrot.lane.b32.xlu0 %v2173_v32, %s1626_s13  ;;  %vm3240_vm15 = vcmp.lt.s32.totalorder %v1913_v2, 14 }
 0x156   : > { %v1005_v4 = vpop.permute.xlu1 %1004  ;;  %v1011_v26 = vpop.permute.xlu0 %1010 }
 0x157   : > { %v1019_v19 = vsel %vm1018_vm5, %v1003_v14, %v1011_v26  ;;  %v1023_v13 = vsel %vm1018_vm5, %v1011_v26, %v1003_v14  ;;  %v1099_v14 = vadd.f32 %v962_v63, %v857_v15 }
 0x158   : > { %v1027_v24 = vsel %vm975_vm10, %v994_v8, %v1023_v13  ;;  %v1028_v21 = vsel %vm3187_vm4, %v998_v9, %v1019_v19  ;;  %625 = vrot.lane.b32.xlu1 %v2157_v25, %s1626_s13  ;;  %720 = vrot.lane.b32.xlu0 %v2169_v29, %s1627_s14  ;;  %v344_v9 = vadd.s32 7, %v2111_v0 }
 0x159   : > { %v1065_v1 = vsel %vm3180_vm2, %v1028_v21, 0.0  ;;  %v1064_v48 = vsel %vm3180_vm2, %v1027_v24, 0.0  ;;  %vm3204_vm2 = vcmp.lt.s32.totalorder %v1913_v2, 1 }
 0x15a   : > { %v1013_v58 = vpop.permute.xlu1 %1012  ;;  %v440_v56 = vpop.permute.xlu0 %439  ;;  %v1113_v53 = vadd.f32 %v1097_v61, %v1065_v1  ;;  %v1112_v20 = vadd.f32 %v1096_v60, %v1064_v48 }
 0x15b   : > { %v1020_v55 = vsel %vm1018_vm5, %v1005_v4, %v1013_v58  ;;  %v1024_v52 = vsel %vm1018_vm5, %v1013_v58, %v1005_v4  ;;  %v1106_v4 = vadd.f32 %v2324_v12, %v1997_v62  ;;  %v345_v62 = vadd.s32 7, %v2113_v57 }
 0x15c   : > { %v1029_v27 = vsel %vm975_vm10, %v995_v51, %v1024_v52  ;;  %v1030_v16 = vsel %vm3187_vm4, %v999_v33, %v1020_v55  ;;  %722 = vrot.lane.b32.xlu1 %v2153_v23, %s1627_s14  ;;  %728 = vrot.lane.b32.xlu0 %v2173_v32, %s1627_s14  ;;  %v1121_v8 = vadd.f32 %v1113_v53, %v1105_v45  ;;  %vm3241_vm4 = vcmp.lt.s32.totalorder %v1915_v3, 14 }
 0x15d   : > { %v1067_v31 = vsel %vm3178_vm8, %v1030_v16, 0.0  ;;  %v1066_v34 = vsel %vm3178_vm8, %v1029_v27, 0.0  ;;  %v1120_v40 = vadd.f32 %v1112_v20, %v1104_v30  ;;  %vm340_vm8 = vmand %vm336_vm9, %vm332_vm7  ;;  %v2491_v13 = vsel %vm341_vm0, %v345_v62, %v2113_v57 }
 0x15e   : > { %v442_v50 = vpop.permute.xlu1 %441  ;;  %v448_v59 = vpop.permute.xlu0 %447  ;;  %v1115_v63 = vadd.f32 %v1099_v14, %v1067_v31  ;;  %v1114_v26 = vadd.f32 %v1098_v17, %v1066_v34  ;;  %v2484_v19 = vsel %vm340_vm8, %v344_v9, %v2111_v0  ;;  %vm3200_vm8 = vcmp.lt.s32.totalorder %v1706_v10, 113  ;;  %vm3203_vm0 = vmmov %vm3202_vm1 }
 0x15f   : > { %vm3182_vm7 = vcmp.eq.s32.totalorder %v2484_v19, 0  ;;  %vm3185_vm9 = vcmp.eq.s32.totalorder %v2484_v19, 1  ;;  %v453_v0 = vsel %vm3200_vm8, %v440_v56, %v448_v59  ;;  %vm3201_vm11 = vmmov %vm3200_vm8  ;;  %vm3184_vm8 = vcmp.eq.s32.totalorder %v2491_v13, 1 }
 0x160   : > { %730 = vrot.lane.b32.xlu1 %v2157_v25, %s1627_s14  ;;  %825 = vrot.lane.b32.xlu0 %v2169_v29, %s1628_s15  ;;  %v1123_v37 = vadd.f32 %v1115_v63, %v1107_v22  ;;  %v1122_v18 = vadd.f32 %v1114_v26, %v1106_v4  ;;  %v457_v24 = vsel %vm3201_vm11, %v448_v59, %v440_v56  ;;  %v543_v61 = vsel %vm3185_vm9, %v1850_v38, 0.0  ;;  %v1598_v63 = vld [vmem:[%s3145_s2] sm:$0xff]  }
 0x161   : > { %v544_v48 = vsel %vm3185_vm9, %v1867_v43, 0.0  ;;  %v545_v52 = vsel %vm3184_vm8, %v1863_v42, 0.0  ;;  %v546_v53 = vsel %vm3184_vm8, %v1879_v47, 0.0  ;;  %vm3227_vm8 = vcmp.lt.s32.totalorder %v1913_v2, 15 }
 0x162   : > { %v450_v5 = vpop.permute.xlu1 %449  ;;  %v464_v44 = vpop.permute.xlu0 %463  ;;  %v1181_v11 = vpack.c.bf16 %v1123_v37, %v1121_v8  ;;  %v2481_v12 = vpack.c.bf16 %v1122_v18, %v1120_v40  ;;  %vm3189_vm9 = vcmp.eq.s32.totalorder %v2491_v13, 2 }
 0x164   : > { %827 = vrot.lane.b32.xlu1 %v2153_v23, %s1628_s15  ;;  %833 = vrot.lane.b32.xlu0 %v2173_v32, %s1628_s15 }
 0x165   : > { %1278 = vmatprep.subr.bf16.mxu0 %v1181_v11 }
 0x166   : > { %1279 = vmatpush1.bf16.msra.mxu0 %v2481_v12  ;;  %v466_v36 = vpop.permute.xlu1 %465  ;;  %v472_v28 = vpop.permute.xlu0 %471 }
 0x167   : > { %v477_v21 = vsel %vm3202_vm1, %v464_v44, %v472_v28  ;;  %v481_v57 = vsel %vm3203_vm0, %v472_v28, %v464_v44  ;;  %vm3208_vm1 = vmmov %vm3203_vm0  ;;  %v3221_v28 = vld [vmem:[#allocation3_spill] sm:$0xff] }
 0x168   : > { %v487_v15 = vsel %vm3204_vm2, %v453_v0, %v481_v57  ;;  %v488_v1 = vsel %vm3205_vm14, %v457_v24, %v477_v21  ;;  %835 = vrot.lane.b32.xlu1 %v2157_v25, %s1628_s15  ;;  %930 = vrot.lane.b32.xlu0 %v2169_v29, %s1629_s16  ;;  %vm3183_vm14 = vcmp.eq.s32.totalorder %v2491_v13, 0  ;;  %vm3206_vm2 = vmmov %vm3201_vm11 }
 0x169   : > { %v523_v51 = vsel %vm3182_vm7, %v487_v15, 0.0  ;;  %v524_v58 = vsel %vm3182_vm7, %v488_v1, 0.0  ;;  %v454_v38 = vsel %vm3206_vm2, %v442_v50, %v450_v5  ;;  %vm3207_vm11 = vmmov %vm3206_vm2  ;;  %vm3209_vm7 = vcmp.lt.s32.totalorder %v1913_v2, 1 }
 0x16a   : > { %v2523_v56 = vadd.f32 %v543_v61, %v523_v51  ;;  %v2525_v14 = vadd.f32 %v544_v48, %v524_v58  ;;  %v474_v60 = vpop.permute.xlu1 %473  ;;  %v562_v17 = vpop.permute.xlu0 %561  ;;  %v458_v43 = vsel %vm3207_vm11, %v450_v5, %v442_v50  ;;  %vm3210_vm2 = vcmp.lt.s32.totalorder %v1915_v3, 1 }
 0x16b   : > { %v478_v33 = vsel %vm3208_vm1, %v466_v36, %v474_v60  ;;  %v482_v55 = vsel %vm3203_vm0, %v474_v60, %v466_v36  ;;  %vm3192_vm1 = vcmask 261120   ;;  %v3220_v36 = vld [vmem:[#allocation2_spill] sm:$0xff] }
 0x16c   : > { %v489_v27 = vsel %vm3209_vm7, %v454_v38, %v482_v55  ;;  %v490_v16 = vsel %vm3210_vm2, %v458_v43, %v478_v33  ;;  %932 = vrot.lane.b32.xlu1 %v2153_v23, %s1629_s16  ;;  %938 = vrot.lane.b32.xlu0 %v2173_v32, %s1629_s16  ;;  %vm3211_vm7 = vcmp.lt.s32.totalorder %v1706_v10, 127 }
 0x16d   : > { %v525_v20 = vsel %vm3183_vm14, %v489_v27, 0.0  ;;  %v526_v42 = vsel %vm3183_vm14, %v490_v16, 0.0  ;;  %v1191_v31 = vpack.c.bf16 %v490_v16, %v488_v1  ;;  %v1190_v47 = vpack.c.bf16 %v489_v27, %v487_v15  ;;  %vm3212_vm11 = vmmov %vm3211_vm7 }
 0x16e   : > { %v2554_v45 = vadd.f32 %v545_v52, %v525_v20  ;;  %v2556_v34 = vadd.f32 %v546_v53, %v526_v42  ;;  %v564_v30 = vpop.permute.xlu1 %563  ;;  %v570_v50 = vpop.permute.xlu0 %569  ;;  %vm3213_vm0 = vmmov %vm3211_vm7 }
 0x16f   : > { %v576_v59 = vsel %vm3211_vm7, %v562_v17, %v570_v50  ;;  %v580_v22 = vsel %vm3212_vm11, %v570_v50, %v562_v17  ;;  %1211 = vmatprep.subr.bf16.mxu1 %v1191_v31  ;;  %vm3214_vm2 = vmmov %vm3213_vm0  ;;  %vm3215_vm7 = vcmp.lt.s32.totalorder %v1706_v10, 113  ;;  %vm3216_vm11 = vcmp.lt.s32.totalorder %v1706_v10, 1 }
 0x170   : > { %940 = vrot.lane.b32.xlu1 %v2157_v25, %s1629_s16  ;;  %1035 = vrot.lane.b32.xlu0 %v2169_v29, %s1630_s17  ;;  %v396_v37 = vsel %vm3215_vm7, %v1839_v35, %v1859_v41  ;;  %v425_v40 = vsel %vm3216_vm11, %v1894_v54, %v1882_v49 }
 0x171   : > { %1212 = vmatpush1.bf16.msra.mxu1 %v1190_v47 }
 0x172   : > { %1541 = vmatprep.subr.bf16.mxu1 %v1181_v11  ;;  %v572_v4 = vpop.permute.xlu1 %571  ;;  %v587_v26 = vpop.permute.xlu0 %586  ;;  %v3219_v11 = vmov 0  }
 0x173   : > { %v577_v8 = vsel %vm3213_vm0, %v564_v30, %v572_v4  ;;  %v581_v9 = vsel %vm3214_vm2, %v572_v4, %v564_v30  ;;  %vm3217_vm0 = vmmov %vm3215_vm7 }
 0x174   : > { %1037 = vrot.lane.b32.xlu1 %v2153_v23, %s1630_s17  ;;  %1043 = vrot.lane.b32.xlu0 %v2173_v32, %s1630_s17  ;;  %v397_v18 = vsel %vm3217_vm0, %v1852_v39, %v1875_v46  ;;  %vm3218_vm2 = vmmov %vm3217_vm0  ;;  %vm3224_vm0 = vcmp.lt.s32.totalorder %v1706_v10, 15 }
 0x175   : > { %1527 = vmatmul.mubr.msk.bf16.vlgmr.msra.gmra.mrb[0].mxu1 %vm3192_vm1, %v1598_v63  ;;  %v400_v62 = vsel %vm3218_vm2, %v1859_v41, %v1839_v35  ;;  %vm3222_vm7 = vmmov %vm3216_vm11  ;;  %vm3223_vm11 = vcmp.lt.s32.totalorder %v1913_v2, 1 }
 0x176   : > { %1543 = vmatpush1.bf16.msra.mxu1 %v2481_v12  ;;  %v589_v5 = vpop.permute.xlu1 %588  ;;  %v595_v44 = vpop.permute.xlu0 %594  ;;  %1251 = vmatprep.mubr.bf16.mxu1 %v3219_v11  ;;  %v426_v0 = vsel %vm3222_vm7, %v3221_v28, %v3220_v36  ;;  %v2602_v24 = vsel %vm3223_vm11, %v396_v37, %v425_v40  ;;  %vm3225_vm2 = vmmov %vm3224_vm0  ;;  %vm3229_vm11 = vcmp.lt.s32.totalorder %v1706_v10, 113 }
 0x177   : > { %v601_v21 = vsel %vm3224_vm0, %v587_v26, %v595_v44  ;;  %v605_v35 = vsel %vm3225_vm2, %v595_v44, %v587_v26  ;;  %vm3226_vm14 = vmmov %vm3222_vm7  ;;  %vm3228_vm7 = vcmp.lt.s32.totalorder %v1915_v3, 15  ;;  %v401_v15 = vsel %vm3229_vm11, %v1875_v46, %v1852_v39 }
 0x178   : > { %v421_v41 = vsel %vm3226_vm14, %v1882_v49, %v1894_v54  ;;  %v611_v12 = vsel %vm3227_vm8, %v576_v59, %v605_v35  ;;  %v612_v57 = vsel %vm3228_vm7, %v580_v22, %v601_v21  ;;  %1045 = vrot.lane.b32.xlu1 %v2157_v25, %s1630_s17  ;;  %495 = vrot.lane.b32.xlu0 %v2602_v24, %s1613_s25  ;;  %vm3230_vm14 = vcmp.lt.s32.totalorder %v1913_v2, 1  ;;  %vm3232_vm2 = vmmov %vm3224_vm0 }
 0x179   : > { %v2626_v49 = vsel %vm3230_vm14, %v397_v18, %v426_v0  ;;  %vm3231_vm8 = vcmp.lt.s32.totalorder %v1915_v3, 1  ;;  %vm3233_vm7 = vcmp.lt.s32.totalorder %v1706_v10, 1  ;;  %vm3234_vm11 = vcmp.lt.s32.totalorder %v1913_v2, 15 }
 0x17a   : > { %v597_v1 = vpop.permute.xlu1 %596  ;;  %v667_v61 = vpop.permute.xlu0 %666  ;;  %v2630_v54 = vsel %vm3231_vm8, %v400_v62, %v421_v41  ;;  %v422_v39 = vsel %vm3233_vm7, %v3220_v36, %v3221_v28  ;;  %vm3235_vm14 = vcmp.lt.s32.totalorder %v1915_v3, 15  ;;  %vm3236_vm7 = vcmp.lt.s32.totalorder %v1706_v10, 126 }
 0x17b   : > { %v602_v48 = vsel %vm3224_vm0, %v589_v5, %v597_v1  ;;  %v606_v51 = vsel %vm3232_vm2, %v597_v1, %v589_v5  ;;  %v2650_v38 = vsel %vm3231_vm8, %v401_v15, %v422_v39  ;;  %vm3188_vm0 = vcmp.eq.s32.totalorder %v2484_v19, 2 }
 0x17c   : > { %v613_v46 = vsel %vm3234_vm11, %v577_v8, %v606_v51  ;;  %v614_v58 = vsel %vm3235_vm14, %v581_v9, %v602_v48  ;;  %497 = vrot.lane.b32.xlu1 %v2626_v49, %s1613_s25  ;;  %503 = vrot.lane.b32.xlu0 %v2630_v54, %s1613_s25  ;;  %vm3191_vm2 = vcmp.eq.s32.totalorder %v2484_v19, 3  ;;  %vm3237_vm11 = vmmov %vm3236_vm7  ;;  %vm3238_vm14 = vcmp.lt.s32.totalorder %v1706_v10, 14 }
 0x17d   : > { %vm3239_vm8 = vmmov %vm3238_vm14  ;;  %v648_v47 = vsel %vm3188_vm0, %v611_v12, 0.0  ;;  %v649_v30 = vsel %vm3188_vm0, %v612_v57, 0.0  ;;  %v650_v18 = vsel %vm3189_vm9, %v613_v46, 0.0  ;;  %vm3247_vm0 = vcmp.lt.s32.totalorder %v1915_v3, 14 }
 0x17e   : > { %v669_v60 = vpop.permute.xlu1 %668  ;;  %v675_v17 = vpop.permute.xlu0 %674  ;;  %v651_v36 = vsel %vm3189_vm9, %v614_v58, 0.0 }
 0x17f   : > { %v681_v53 = vsel %vm3236_vm7, %v667_v61, %v675_v17  ;;  %v685_v27 = vsel %vm3237_vm11, %v675_v17, %v667_v61  ;;  %vm3244_vm11 = vmmov %vm3239_vm8  ;;  %v1600_v61 = vld [vmem:[%s3145_s2 + $0x8] sm:$0xff]  }
 0x180   : > { %505 = vrot.lane.b32.xlu1 %v2650_v38, %s1613_s25  ;;  %619 = vrot.lane.b32.xlu0 %v2602_v24, %s1626_s13 }
 0x181   : > { %1528 = vmatmul.mubr.msk.bf16.gmra.mrb[4].mxu1 %vm3192_vm1, %v1600_v61  ;;  %vm3257_vm1 = vcmp.lt.s32.totalorder %v1915_v3, 12 }
 0x182   : > { %v677_v43 = vpop.permute.xlu1 %676  ;;  %v692_v33 = vpop.permute.xlu0 %691  ;;  %1320 = vmatprep.mubr.bf16.mxu1 %v3219_v11 }
 0x184   : > { %621 = vrot.lane.b32.xlu1 %v2626_v49, %s1626_s13  ;;  %627 = vrot.lane.b32.xlu0 %v2630_v54, %s1626_s13 }
 0x186   : > { %v694_v55 = vpop.permute.xlu1 %693  ;;  %v700_v52 = vpop.permute.xlu0 %699 }
 0x187   : > { %v706_v16 = vsel %vm3238_vm14, %v692_v33, %v700_v52  ;;  %v710_v20 = vsel %vm3239_vm8, %v700_v52, %v692_v33  ;;  %vm3245_vm14 = vmmov %vm3239_vm8  ;;  %vm3246_vm8 = vcmp.lt.s32.totalorder %v1913_v2, 14 }
 0x188   : > { %v716_v42 = vsel %vm3240_vm15, %v681_v53, %v710_v20  ;;  %v717_v31 = vsel %vm3241_vm4, %v685_v27, %v706_v16  ;;  %629 = vrot.lane.b32.xlu1 %v2650_v38, %s1626_s13  ;;  %724 = vrot.lane.b32.xlu0 %v2602_v24, %s1627_s14  ;;  %vm3190_vm15 = vcmp.eq.s32.totalorder %v2491_v13, 3  ;;  %vm3242_vm4 = vmmov %vm3236_vm7  ;;  %v1416_v20 = vld [vmem:[%s3147_s4] sm:$0xff] }
 0x189   : > { %v753_v50 = vsel %vm3191_vm2, %v716_v42, 0.0  ;;  %v754_v59 = vsel %vm3191_vm2, %v717_v31, 0.0  ;;  %v682_v8 = vsel %vm3242_vm4, %v669_v60, %v677_v43  ;;  %vm3243_vm7 = vmmov %vm3242_vm4  ;;  %vm853_vm4 = vcmp.eq.s32.totalorder %v2491_v13, 4  ;;  %v1417_v42 = vld [vmem:[%s3147_s4 + $0x8] sm:$0xff] }
 0x18a   : > { %v1092_v22 = vadd.f32 %v753_v50, %v648_v47  ;;  %v1093_v63 = vadd.f32 %v754_v59, %v649_v30  ;;  %v702_v4 = vpop.permute.xlu1 %701  ;;  %v2688_v26 = vpop.permute.xlu0 %771  ;;  %v686_v9 = vsel %vm3243_vm7, %v677_v43, %v669_v60  ;;  %vm957_vm7 = vcmp.eq.s32.totalorder %v2484_v19, 5 }
 0x18b   : > { %v707_v37 = vsel %vm3244_vm11, %v694_v55, %v702_v4  ;;  %v711_v40 = vsel %vm3245_vm14, %v702_v4, %v694_v55  ;;  %vm958_vm11 = vcmp.eq.s32.totalorder %v2491_v13, 5  ;;  %v1418_v4 = vld [vmem:[%s3147_s4 + $0x10] sm:$0xff] }
 0x18c   : > { %v718_v62 = vsel %vm3246_vm8, %v682_v8, %v711_v40  ;;  %v719_v5 = vsel %vm3247_vm0, %v686_v9, %v707_v37  ;;  %726 = vrot.lane.b32.xlu1 %v2626_v49, %s1627_s14  ;;  %732 = vrot.lane.b32.xlu0 %v2630_v54, %s1627_s14  ;;  %v2709_v44 = vadd.f32 %v1093_v63, %v2525_v14  ;;  %vm852_vm0 = vcmp.eq.s32.totalorder %v2484_v19, 4  ;;  %v1419_v8 = vld [vmem:[%s3147_s4 + $0x18] sm:$0xff] }
 0x18d   : > { %v755_v28 = vsel %vm3190_vm15, %v718_v62, 0.0  ;;  %v756_v0 = vsel %vm3190_vm15, %v719_v5, 0.0  ;;  %v2718_v21 = vadd.f32 %v1092_v22, %v2523_v56  ;;  %vm3248_vm8 = vcmp.lt.s32.totalorder %v1706_v10, 13 }
 0x18e   : > { %v1094_v35 = vadd.f32 %v755_v28, %v650_v18  ;;  %v1095_v41 = vadd.f32 %v756_v0, %v651_v36  ;;  %v2720_v12 = vpop.permute.xlu1 %773  ;;  %v2722_v57 = vpop.permute.xlu0 %779  ;;  %vm3249_vm9 = vmmov %vm3248_vm8 }
 0x18f   : > { %v786_v27 = vsel %vm783_vm13, %v2688_v26, %v2722_v57  ;;  %vm3250_vm15 = vmmov %vm3248_vm8 }
 0x190   : > { %734 = vrot.lane.b32.xlu1 %v2650_v38, %s1627_s14  ;;  %829 = vrot.lane.b32.xlu0 %v2602_v24, %s1628_s15  ;;  %v2729_v14 = vadd.f32 %v1095_v41, %v2556_v34  ;;  %v2732_v15 = vadd.f32 %v1094_v35, %v2554_v45  ;;  %vm3251_vm2 = vmmov %vm3248_vm8  ;;  %v790_v41 = vsel %vm783_vm13, %v2722_v57, %v2688_v26 }
 0x192   : > { %v2734_v56 = vpop.permute.xlu1 %781  ;;  %v797_v1 = vpop.permute.xlu0 %796 }
 0x193   : > { %v791_v61 = vsel %vm783_vm13, %v2734_v56, %v2720_v12 }
 0x194   : > { %831 = vrot.lane.b32.xlu1 %v2626_v49, %s1628_s15  ;;  %837 = vrot.lane.b32.xlu0 %v2630_v54, %s1628_s15 }
 0x196   : > { %v799_v48 = vpop.permute.xlu1 %798  ;;  %v805_v51 = vpop.permute.xlu0 %804 }
 0x197   : > { %v811_v50 = vsel %vm3248_vm8, %v797_v1, %v805_v51  ;;  %v815_v59 = vsel %vm3249_vm9, %v805_v51, %v797_v1  ;;  %v787_v1 = vsel %vm783_vm13, %v2720_v12, %v2734_v56  ;;  %vm3262_vm13 = vcmp.lt.s32.totalorder %v1915_v3, 11 }
 0x198   : > { %839 = vrot.lane.b32.xlu1 %v2650_v38, %s1628_s15  ;;  %934 = vrot.lane.b32.xlu0 %v2602_v24, %s1629_s16  ;;  %v822_v26 = vsel %vm766_vm3, %v790_v41, %v811_v50 }
 0x19a   : > { %v807_v45 = vpop.permute.xlu1 %806  ;;  %v877_v34 = vpop.permute.xlu0 %876 }
 0x19b   : > { %v812_v22 = vsel %vm3250_vm15, %v799_v48, %v807_v45  ;;  %v816_v63 = vsel %vm3251_vm2, %v807_v45, %v799_v48  ;;  %vm3256_vm2 = vcmp.lt.s32.totalorder %v1913_v2, 12 }
 0x19c   : > { %936 = vrot.lane.b32.xlu1 %v2626_v49, %s1629_s16  ;;  %942 = vrot.lane.b32.xlu0 %v2630_v54, %s1629_s16  ;;  %vm3258_vm14 = vmmov %vm3256_vm2  ;;  %v824_v51 = vsel %vm766_vm3, %v791_v61, %v812_v22  ;;  %vm3263_vm3 = vcmp.eq.s32.totalorder %v2484_v19, 6 }
 0x19e   : > { %v879_v39 = vpop.permute.xlu1 %878  ;;  %v885_v46 = vpop.permute.xlu0 %884 }
 0x1a0   : > { %944 = vrot.lane.b32.xlu1 %v2650_v38, %s1629_s16  ;;  %1039 = vrot.lane.b32.xlu0 %v2602_v24, %s1630_s17 }
 0x1a2   : > { %v887_v58 = vpop.permute.xlu1 %886  ;;  %v902_v60 = vpop.permute.xlu0 %901 }
 0x1a4   : > { %1041 = vrot.lane.b32.xlu1 %v2626_v49, %s1630_s17  ;;  %1047 = vrot.lane.b32.xlu0 %v2630_v54, %s1630_s17 }
 0x1a6   : > { %v904_v17 = vpop.permute.xlu1 %903  ;;  %v910_v43 = vpop.permute.xlu0 %909 }
 0x1a7   : > { %v916_v16 = vsel %vm913_vm12, %v902_v60, %v910_v43  ;;  %v920_v31 = vsel %vm913_vm12, %v910_v43, %v902_v60 }
 0x1a8   : > { %1049 = vrot.lane.b32.xlu1 %v2650_v38, %s1630_s17  ;;  %1422 = vperm.xlu0 %1596, %v1416_v20  }
 0x1aa   : > { %v912_v33 = vpop.permute.xlu1 %911  ;;  %v982_v55 = vpop.permute.xlu0 %981 }
 0x1ab   : > { %v917_v47 = vsel %vm913_vm12, %v904_v17, %v912_v33  ;;  %v921_v30 = vsel %vm913_vm12, %v912_v33, %v904_v17  ;;  %vm3252_vm12 = vcmp.lt.s32.totalorder %v1706_v10, 124 }
 0x1ac   : > { %1427 = vperm.xlu1 %1597, %v1417_v42   ;;  %v891_v9 = vsel %vm3252_vm12, %v877_v34, %v885_v46  ;;  %vm3253_vm8 = vmmov %vm3252_vm12  ;;  %1437 = vperm.xlu0 %1596, %v1419_v8  }
 0x1ad   : > { %v895_v37 = vsel %vm3253_vm8, %v885_v46, %v877_v34  ;;  %vm3254_vm9 = vmmov %vm3253_vm8  ;;  %v926_v36 = vsel %vm3256_vm2, %v891_v9, %v920_v31 }
 0x1ae   : > { %v2765_v52 = vpop.permute.xlu1 %983  ;;  %v990_v53 = vpop.permute.xlu0 %989  ;;  %v892_v40 = vsel %vm3254_vm9, %v879_v39, %v887_v58  ;;  %vm3255_vm15 = vmmov %vm3253_vm8  ;;  %v927_v28 = vsel %vm3257_vm1, %v895_v37, %v916_v16  ;;  %v963_v45 = vsel %vm957_vm7, %v926_v36, 0.0 }
 0x1af   : > { %v896_v18 = vsel %vm3255_vm15, %v887_v58, %v879_v39  ;;  %v928_v0 = vsel %vm3258_vm14, %v892_v40, %v921_v30  ;;  %vm3259_vm12 = vmmov %vm3257_vm1  ;;  %vm3193_vm1 = vcmp.eq.s32.totalorder %v2491_v13, 6  ;;  %vm3260_vm14 = vcmp.lt.s32.totalorder %v1913_v2, 13 }
 0x1b0   : > { %v929_v35 = vsel %vm3259_vm12, %v896_v18, %v917_v47  ;;  %1432 = vperm.xlu1 %1597, %v1418_v4   ;;  %v821_v48 = vsel %vm3260_vm14, %v786_v27, %v815_v59  ;;  %vm3261_vm8 = vmmov %vm3260_vm14  ;;  %v964_v12 = vsel %vm957_vm7, %v927_v28, 0.0  ;;  %v965_v56 = vsel %vm958_vm11, %v928_v0, 0.0 }
 0x1b1   : > { %v823_v57 = vsel %vm3261_vm8, %v787_v1, %v816_v63  ;;  %v966_v34 = vsel %vm958_vm11, %v929_v35, 0.0  ;;  %v996_v58 = vsel %vm993_vm6, %v982_v55, %v990_v53  ;;  %v1000_v60 = vsel %vm993_vm6, %v990_v53, %v982_v55  ;;  %vm3264_vm9 = vmmov %vm3263_vm3 }
 0x1b2   : > { %v992_v62 = vpop.permute.xlu1 %991  ;;  %v1007_v5 = vpop.permute.xlu0 %1006  ;;  %v858_v33 = vsel %vm852_vm0, %v821_v48, 0.0  ;;  %v859_v27 = vsel %vm852_vm0, %v822_v26, 0.0  ;;  %v860_v55 = vsel %vm853_vm4, %v823_v57, 0.0  ;;  %v861_v53 = vsel %vm853_vm4, %v824_v51, 0.0  ;;  %vm3265_vm15 = vmmov %vm3262_vm13 }
 0x1b3   : > { %v1100_v47 = vadd.f32 %v963_v45, %v858_v33  ;;  %v1101_v30 = vadd.f32 %v964_v12, %v859_v27  ;;  %v1102_v50 = vadd.f32 %v965_v56, %v860_v55  ;;  %v1103_v59 = vadd.f32 %v966_v34, %v861_v53  ;;  %v1599_v45 = vld [vmem:[%s3144_s1] sm:$0xff]  }
 0x1b4   : > { %v997_v4 = vsel %vm993_vm6, %v2765_v52, %v992_v62  ;;  %v1001_v8 = vsel %vm993_vm6, %v992_v62, %v2765_v52  ;;  %vm3268_vm6 = vcmp.lt.s32.totalorder %v1706_v10, 16  ;;  %vm3270_vm12 = vcmp.eq.s32.totalorder %v1917_v6, 1 }
 0x1b5   : > { %vm3269_vm2 = vmmov %vm3268_vm6  ;;  %vm3271_vm14 = vcmp.eq.s32.totalorder %v1924_v7, 1  ;;  %vm736_vm8 = vcmp.lt.s32.totalorder %v1706_v10, 96 }
 0x1b6   : > { %v1009_v39 = vpop.permute.xlu1 %1008  ;;  %v1015_v46 = vpop.permute.xlu0 %1014 }
 0x1b7   : > { %v1021_v17 = vsel %vm1018_vm5, %v1007_v5, %v1015_v46  ;;  %v1025_v43 = vsel %vm1018_vm5, %v1015_v46, %v1007_v5 }
 0x1b8   : > { %v1031_v16 = vsel %vm975_vm10, %v996_v58, %v1025_v43  ;;  %v1032_v20 = vsel %vm3262_vm13, %v1000_v60, %v1021_v17  ;;  %vm3272_vm13 = vmmov %vm3270_vm12 }
 0x1b9   : > { %v1068_v42 = vsel %vm3263_vm3, %v1031_v16, 0.0  ;;  %v1069_v31 = vsel %vm3264_vm9, %v1032_v20, 0.0  ;;  %v547_v16 = vsel %vm3270_vm12, %v2169_v29, 0.0  ;;  %v2912_v20 = vsel %vm3271_vm14, %v2153_v23, 0.0  ;;  %vm3273_vm3 = vmmov %vm3271_vm14 }
 0x1ba   : > { %v1017_v22 = vpop.permute.xlu1 %1016  ;;  %v492_v63 = vpop.permute.xlu0 %491  ;;  %v1116_v40 = vadd.f32 %v1100_v47, %v1068_v42  ;;  %v1117_v18 = vadd.f32 %v1101_v30, %v1069_v31  ;;  %v548_v55 = vsel %vm3272_vm13, %v2173_v32, 0.0  ;;  %v550_v53 = vsel %vm3273_vm3, %v2157_v25, 0.0 }
 0x1bb   : > { %v1022_v9 = vsel %vm1018_vm5, %v1009_v39, %v1017_v22  ;;  %v1026_v37 = vsel %vm1018_vm5, %v1017_v22, %v1009_v39  ;;  %vm631_vm9 = vcmp.lt.s32.totalorder %v1706_v10, 112  ;;  %vm3276_vm12 = vcmp.lt.s32.totalorder %v1706_v10, 16 }
 0x1bc   : > { %v1033_v5 = vsel %vm975_vm10, %v997_v4, %v1026_v37  ;;  %v1034_v36 = vsel %vm3265_vm15, %v1001_v8, %v1022_v9  ;;  %v1125_v1 = vadd.f32 %v1117_v18, %v2709_v44  ;;  %v1124_v2 = vadd.f32 %v1116_v40, %v2718_v21  ;;  %v1601_v44 = vld [vmem:[%s3144_s1 + $0x8] sm:$0xff]   ;;  %vm3277_vm14 = vmmov %vm3276_vm12 }
 0x1bd   : > { %v1070_v28 = vsel %vm3193_vm1, %v1033_v5, 0.0  ;;  %v1071_v52 = vsel %vm3193_vm1, %v1034_v36, 0.0  ;;  %vm3266_vm10 = vcmask 261120   ;;  %vm841_vm15 = vcmp.lt.s32.totalorder %v1706_v10, 80 }
 0x1be   : > { %v1118_v62 = vadd.f32 %v1102_v50, %v1070_v28  ;;  %v1119_v0 = vadd.f32 %v1103_v59, %v1071_v52  ;;  %v494_v35 = vpop.permute.xlu1 %493  ;;  %v500_v41 = vpop.permute.xlu0 %499  ;;  %vm3267_vm5 = vmmov %vm3266_vm10  ;;  %vm3278_vm13 = vcmp.eq.s32.totalorder %v1924_v7, 0  ;;  %vm3284_vm1 = vcmp.eq.s32.totalorder %v1924_v7, 3 }
 0x1bf   : > { %v507_v17 = vsel %vm3268_vm6, %v492_v63, %v500_v41  ;;  %v511_v43 = vsel %vm3269_vm2, %v500_v41, %v492_v63  ;;  %vm946_vm6 = vcmp.lt.s32.totalorder %v1706_v10, 64  ;;  %vm1051_vm2 = vcmp.lt.s32.totalorder %v1706_v10, 48  ;;  %vm3279_vm3 = vmmov %vm3278_vm13 }
 0x1c0   : > { %v1127_v61 = vadd.f32 %v1119_v0, %v2729_v14  ;;  %v1126_v48 = vadd.f32 %v1118_v62, %v2732_v15 }
 0x1c2   : > { %v502_v3 = vpop.permute.xlu1 %501  ;;  %v616_v26 = vpop.permute.xlu0 %615  ;;  %v1183_v57 = vpack.c.bf16 %v1127_v61, %v1125_v1  ;;  %v1182_v51 = vpack.c.bf16 %v1126_v48, %v1124_v2 }
 0x1c3   : > { %v508_v32 = vsel %vm3276_vm12, %v494_v35, %v502_v3  ;;  %v512_v25 = vsel %vm3277_vm14, %v502_v3, %v494_v35  ;;  %vm3282_vm12 = vcmp.eq.s32.totalorder %v1917_v6, 2 }
 0x1c4   : > { %1280 = vmatprep.subr.bf16.mxu0 %v1183_v57  ;;  %1542 = vmatprep.subr.bf16.mxu1 %v1183_v57  ;;  %v529_v40 = vsel %vm3278_vm13, %v512_v25, 0.0  ;;  %v530_v18 = vsel %vm3279_vm3, %v508_v32, 0.0  ;;  %vm3283_vm14 = vmmov %vm3282_vm12  ;;  %vm3286_vm3 = vcmp.eq.s32.totalorder %v1924_v7, 2 }
 0x1c5   : > { %1281 = vmatpush1.bf16.msra.mxu0 %v1182_v51  ;;  %1544 = vmatpush1.bf16.msra.mxu1 %v1182_v51  ;;  %vm3285_vm13 = vmmov %vm3284_vm1 }
 0x1c6   : > { %v618_v14 = vpop.permute.xlu1 %617  ;;  %v624_v21 = vpop.permute.xlu0 %623 }
 0x1c7   : > { %v632_v50 = vsel %vm631_vm9, %v616_v26, %v624_v21  ;;  %v636_v59 = vsel %vm631_vm9, %v624_v21, %v616_v26 }
 0x1c8   : > { %1531 = vmatmul.mubr.msk.bf16.vlgmr.msra.gmra.mrb[0].mxu0 %vm3266_vm10, %v1599_v45  ;;  %1532 = vmatmul.mubr.msk.bf16.vlgmr.msra.gmra.mrb[4].mxu1 %vm3267_vm5, %v1601_v44  ;;  %vm3274_vm10 = vcmp.eq.s32.totalorder %v1917_v6, 0  ;;  %v652_v28 = vsel %vm3282_vm12, %v632_v50, 0.0  ;;  %v653_v52 = vsel %vm3283_vm14, %v636_v59, 0.0  ;;  %vm3290_vm12 = vcmp.eq.s32.totalorder %v1924_v7, 5 }
 0x1c9   : > { %1387 = vmatprep.mubr.bf16.mxu0 %v3219_v11  ;;  %v527_v29 = vsel %vm3274_vm10, %v511_v43, 0.0  ;;  %vm3275_vm5 = vmmov %vm3274_vm10  ;;  %vm3280_vm10 = vcmp.eq.s32.totalorder %v1917_v6, 3 }
 0x1ca   : > { %v626_v15 = vpop.permute.xlu1 %625  ;;  %v721_v12 = vpop.permute.xlu0 %720  ;;  %v528_v23 = vsel %vm3275_vm5, %v507_v17, 0.0  ;;  %v1128_v4 = vadd.f32 %v547_v16, %v527_v29  ;;  %vm3281_vm5 = vmmov %vm3280_vm10 }
 0x1cb   : > { %v1129_v8 = vadd.f32 %v548_v55, %v528_v23  ;;  %v633_v9 = vsel %vm631_vm9, %v618_v14, %v626_v15  ;;  %v637_v37 = vsel %vm631_vm9, %v626_v15, %v618_v14  ;;  %vm3291_vm14 = vmmov %vm3290_vm12 }
 0x1cc   : > { %v654_v1 = vsel %vm3286_vm3, %v633_v9, 0.0 }
 0x1ce   : > { %v723_v56 = vpop.permute.xlu1 %722  ;;  %v729_v34 = vpop.permute.xlu0 %728 }
 0x1cf   : > { %v737_v42 = vsel %vm736_vm8, %v721_v12, %v729_v34  ;;  %v741_v31 = vsel %vm736_vm8, %v729_v34, %v721_v12 }
 0x1d0   : > { %v757_v5 = vsel %vm3280_vm10, %v737_v42, 0.0  ;;  %v758_v36 = vsel %vm3281_vm5, %v741_v31, 0.0  ;;  %vm3287_vm10 = vmmov %vm3286_vm3  ;;  %v1130_v42 = vadd.f32 %v2912_v20, %v529_v40  ;;  %v1131_v31 = vadd.f32 %v550_v53, %v530_v18 }
 0x1d1   : > { %v655_v61 = vsel %vm3287_vm10, %v637_v37, 0.0  ;;  %v1136_v3 = vadd.f32 %v757_v5, %v652_v28  ;;  %v1137_v26 = vadd.f32 %v758_v36, %v653_v52  ;;  %vm3294_vm10 = vcmp.eq.s32.totalorder %v1917_v6, 6 }
 0x1d2   : > { %v731_v39 = vpop.permute.xlu1 %730  ;;  %v826_v46 = vpop.permute.xlu0 %825 }
 0x1d3   : > { %v738_v22 = vsel %vm736_vm8, %v723_v56, %v731_v39  ;;  %v742_v63 = vsel %vm736_vm8, %v731_v39, %v723_v56  ;;  %v1152_v37 = vadd.f32 %v1136_v3, %v1128_v4  ;;  %v1153_v5 = vadd.f32 %v1137_v26, %v1129_v8 }
 0x1d4   : > { %v759_v62 = vsel %vm3284_vm1, %v738_v22, 0.0  ;;  %v760_v0 = vsel %vm3285_vm13, %v742_v63, 0.0  ;;  %vm3288_vm1 = vcmp.eq.s32.totalorder %v1917_v6, 5  ;;  %vm3292_vm13 = vcmp.eq.s32.totalorder %v1917_v6, 4 }
 0x1d5   : > { %v1138_v45 = vadd.f32 %v759_v62, %v654_v1  ;;  %v1139_v44 = vadd.f32 %v760_v0, %v655_v61  ;;  %vm3289_vm5 = vmmov %vm3288_vm1 }
 0x1d6   : > { %v828_v58 = vpop.permute.xlu1 %827  ;;  %v834_v60 = vpop.permute.xlu0 %833  ;;  %vm3293_vm3 = vmmov %vm3292_vm13 }
 0x1d7   : > { %v842_v14 = vsel %vm841_vm15, %v826_v46, %v834_v60  ;;  %v846_v21 = vsel %vm841_vm15, %v834_v60, %v826_v46  ;;  %v1154_v53 = vadd.f32 %v1138_v45, %v1130_v42  ;;  %v1155_v40 = vadd.f32 %v1139_v44, %v1131_v31 }
 0x1da   : > { %v836_v33 = vpop.permute.xlu1 %835  ;;  %v931_v27 = vpop.permute.xlu0 %930 }
 0x1db   : > { %v843_v15 = vsel %vm841_vm15, %v828_v58, %v836_v33  ;;  %v847_v12 = vsel %vm841_vm15, %v836_v33, %v828_v58  ;;  %v862_v33 = vsel %vm3292_vm13, %v842_v14, 0.0 }
 0x1de   : > { %v933_v47 = vpop.permute.xlu1 %932  ;;  %v939_v30 = vpop.permute.xlu0 %938 }
 0x1df   : > { %v947_v2 = vsel %vm946_vm6, %v931_v27, %v939_v30  ;;  %v951_v48 = vsel %vm946_vm6, %v939_v30, %v931_v27  ;;  %v863_v27 = vsel %vm3293_vm3, %v846_v21, 0.0  ;;  %vm3300_vm3 = vcmp.lt.s32.totalorder %v1706_v10, 16  ;;  %v1602_v10 = vld [vmem:[%s3146_s3] sm:$0xff]  }
 0x1e0   : > { %v967_v56 = vsel %vm3288_vm1, %v947_v2, 0.0  ;;  %v968_v34 = vsel %vm3289_vm5, %v951_v48, 0.0  ;;  %vm3295_vm1 = vmmov %vm3294_vm10  ;;  %vm3296_vm5 = vcmp.eq.s32.totalorder %v1924_v7, 4 }
 0x1e1   : > { %v864_v29 = vsel %vm3296_vm5, %v843_v15, 0.0  ;;  %v1144_v32 = vadd.f32 %v967_v56, %v862_v33  ;;  %v1145_v25 = vadd.f32 %v968_v34, %v863_v27 }
 0x1e2   : > { %v941_v35 = vpop.permute.xlu1 %940  ;;  %v1036_v41 = vpop.permute.xlu0 %1035 }
 0x1e3   : > { %v948_v57 = vsel %vm946_vm6, %v933_v47, %v941_v35  ;;  %v952_v51 = vsel %vm946_vm6, %v941_v35, %v933_v47 }
 0x1e4   : > { %v969_v43 = vsel %vm3290_vm12, %v948_v57, 0.0  ;;  %v970_v46 = vsel %vm3291_vm14, %v952_v51, 0.0  ;;  %vm3297_vm12 = vmmov %vm3296_vm5  ;;  %vm3298_vm14 = vcmp.eq.s32.totalorder %v1924_v7, 6  ;;  %vm3303_vm5 = vcmp.eq.s32.totalorder %v2491_v13, 1 }
 0x1e5   : > { %v865_v23 = vsel %vm3297_vm12, %v847_v12, 0.0  ;;  %v1146_v47 = vadd.f32 %v969_v43, %v864_v29  ;;  %vm3299_vm13 = vmmov %vm3298_vm14 }
 0x1e6   : > { %v1038_v39 = vpop.permute.xlu1 %1037  ;;  %v1044_v17 = vpop.permute.xlu0 %1043  ;;  %v1147_v30 = vadd.f32 %v970_v46, %v865_v23 }
 0x1e7   : > { %v1052_v60 = vsel %vm1051_vm2, %v1036_v41, %v1044_v17  ;;  %v1056_v58 = vsel %vm1051_vm2, %v1044_v17, %v1036_v41  ;;  %v553_v17 = vsel %vm3303_vm5, %v2626_v49, 0.0 }
 0x1e8   : > { %v1072_v16 = vsel %vm3294_vm10, %v1052_v60, 0.0  ;;  %v1073_v55 = vsel %vm3295_vm1, %v1056_v58, 0.0  ;;  %vm3301_vm10 = vmmov %vm3300_vm3  ;;  %vm3302_vm1 = vcmp.eq.s32.totalorder %v2484_v19, 1 }
 0x1e9   : > { %v1160_v22 = vadd.f32 %v1144_v32, %v1072_v16  ;;  %v1161_v63 = vadd.f32 %v1145_v25, %v1073_v55  ;;  %vm3304_vm12 = vmmov %vm3302_vm1 }
 0x1ea   : > { %v1046_v50 = vpop.permute.xlu1 %1045  ;;  %v496_v59 = vpop.permute.xlu0 %495  ;;  %v552_v43 = vsel %vm3304_vm12, %v2630_v54, 0.0 }
 0x1eb   : > { %v1053_v6 = vsel %vm1051_vm2, %v1038_v39, %v1046_v50  ;;  %v1057_v9 = vsel %vm1051_vm2, %v1046_v50, %v1038_v39  ;;  %v1168_v0 = vadd.f32 %v1160_v22, %v1152_v37  ;;  %v1169_v35 = vadd.f32 %v1161_v63, %v1153_v5 }
 0x1ec   : > { %v1074_v36 = vsel %vm3298_vm14, %v1053_v6, 0.0  ;;  %v1075_v20 = vsel %vm3299_vm13, %v1057_v9, 0.0  ;;  %v551_v39 = vsel %vm3302_vm1, %v2602_v24, 0.0  ;;  %vm3305_vm14 = vcmp.eq.s32.totalorder %v2484_v19, 0  ;;  %vm3308_vm1 = vmmov %vm3301_vm10 }
 0x1ed   : > { %v1162_v18 = vadd.f32 %v1146_v47, %v1074_v36  ;;  %v1163_v28 = vadd.f32 %v1147_v30, %v1075_v20  ;;  %vm3306_vm13 = vmmov %vm3305_vm14 }
 0x1ee   : > { %v498_v52 = vpop.permute.xlu1 %497  ;;  %v504_v62 = vpop.permute.xlu0 %503 }
 0x1ef   : > { %v1170_v41 = vadd.f32 %v1162_v18, %v1154_v53  ;;  %v1171_v1 = vadd.f32 %v1163_v28, %v1155_v40  ;;  %v509_v15 = vsel %vm3300_vm3, %v496_v59, %v504_v62  ;;  %v513_v12 = vsel %vm3301_vm10, %v504_v62, %v496_v59  ;;  %vm3307_vm3 = vmmov %vm3303_vm5 }
 0x1f0   : > { %v531_v46 = vsel %vm3305_vm14, %v513_v12, 0.0  ;;  %v532_v60 = vsel %vm3306_vm13, %v509_v15, 0.0  ;;  %v554_v58 = vsel %vm3307_vm3, %v2650_v38, 0.0  ;;  %vm3309_vm5 = vcmp.eq.s32.totalorder %v2491_v13, 0 }
 0x1f1   : > { %v1336_v61 = vpack.c.bf16 %v1171_v1, %v1169_v35  ;;  %v1335_v2 = vpack.c.bf16 %v1170_v41, %v1168_v0  ;;  %v1132_v32 = vadd.f32 %v551_v39, %v531_v46  ;;  %v1133_v25 = vadd.f32 %v552_v43, %v532_v60  ;;  %vm3310_vm12 = vmmov %vm3309_vm5 }
 0x1f2   : > { %v506_v4 = vpop.permute.xlu1 %505  ;;  %v620_v8 = vpop.permute.xlu0 %619  ;;  %vm3311_vm14 = vcmp.eq.s32.totalorder %v2484_v19, 3 }
 0x1f3   : > { %1355 = vmatprep.subr.bf16.mxu0 %v1336_v61  ;;  %v510_v24 = vsel %vm3301_vm10, %v498_v52, %v506_v4  ;;  %v514_v49 = vsel %vm3308_vm1, %v506_v4, %v498_v52  ;;  %vm3312_vm13 = vmmov %vm3311_vm14  ;;  %vm3317_vm1 = vcmp.eq.s32.totalorder %v2491_v13, 2 }
 0x1f4   : > { %1356 = vmatpush1.bf16.msra.mxu0 %v1335_v2  ;;  %v533_v47 = vsel %vm3309_vm5, %v514_v49, 0.0  ;;  %v534_v30 = vsel %vm3310_vm12, %v510_v24, 0.0  ;;  %vm3318_vm5 = vmmov %vm3317_vm1 }
 0x1f5   : > { %v1134_v39 = vadd.f32 %v553_v17, %v533_v47  ;;  %v1135_v43 = vadd.f32 %v554_v58, %v534_v30 }
 0x1f6   : > { %v622_v48 = vpop.permute.xlu1 %621  ;;  %v628_v3 = vpop.permute.xlu0 %627 }
 0x1f7   : > { %v634_v55 = vsel %vm631_vm9, %v620_v8, %v628_v3  ;;  %v638_v38 = vsel %vm631_vm9, %v628_v3, %v620_v8 }
 0x1fa   : > { %v630_v7 = vpop.permute.xlu1 %629  ;;  %v725_v26 = vpop.permute.xlu0 %724 }
 0x1fb   : > { %v635_v42 = vsel %vm631_vm9, %v622_v48, %v630_v7  ;;  %v639_v31 = vsel %vm631_vm9, %v630_v7, %v622_v48  ;;  %vm3315_vm9 = vcmp.eq.s32.totalorder %v2491_v13, 3 }
 0x1fc   : > { %vm3316_vm10 = vmmov %vm3315_vm9  ;;  %v658_v36 = vsel %vm3317_vm1, %v635_v42, 0.0  ;;  %v659_v20 = vsel %vm3318_vm5, %v639_v31, 0.0 }
 0x1fe   : > { %v727_v57 = vpop.permute.xlu1 %726  ;;  %v733_v51 = vpop.permute.xlu0 %732 }
 0x1ff   : > { %v739_v33 = vsel %vm736_vm8, %v725_v26, %v733_v51  ;;  %v743_v54 = vsel %vm736_vm8, %v733_v51, %v725_v26 }
 0x200   : > { %v761_v50 = vsel %vm3311_vm14, %v739_v33, 0.0  ;;  %v762_v59 = vsel %vm3312_vm13, %v743_v54, 0.0 }
 0x202   : > { %v735_v45 = vpop.permute.xlu1 %734  ;;  %v830_v44 = vpop.permute.xlu0 %829 }
 0x203   : > { %v740_v29 = vsel %vm736_vm8, %v727_v57, %v735_v45  ;;  %v744_v23 = vsel %vm736_vm8, %v735_v45, %v727_v57  ;;  %vm3313_vm8 = vcmp.eq.s32.totalorder %v2484_v19, 2 }
 0x204   : > { %v656_v22 = vsel %vm3313_vm8, %v634_v55, 0.0  ;;  %vm3314_vm3 = vmmov %vm3313_vm8  ;;  %v763_v6 = vsel %vm3315_vm9, %v740_v29, 0.0  ;;  %v764_v9 = vsel %vm3316_vm10, %v744_v23, 0.0 }
 0x205   : > { %v657_v63 = vsel %vm3314_vm3, %v638_v38, 0.0  ;;  %v1140_v18 = vadd.f32 %v761_v50, %v656_v22  ;;  %v1142_v0 = vadd.f32 %v763_v6, %v658_v36  ;;  %v1143_v35 = vadd.f32 %v764_v9, %v659_v20 }
 0x206   : > { %v832_v14 = vpop.permute.xlu1 %831  ;;  %v838_v21 = vpop.permute.xlu0 %837  ;;  %v1141_v28 = vadd.f32 %v762_v59, %v657_v63 }
 0x207   : > { %v844_v41 = vsel %vm841_vm15, %v830_v44, %v838_v21  ;;  %v848_v1 = vsel %vm841_vm15, %v838_v21, %v830_v44  ;;  %v1158_v58 = vadd.f32 %v1142_v0, %v1134_v39  ;;  %v1159_v38 = vadd.f32 %v1143_v35, %v1135_v43 }
 0x208   : > { %v866_v45 = vsel %vm852_vm0, %v844_v41, 0.0  ;;  %v867_v44 = vsel %vm852_vm0, %v848_v1, 0.0  ;;  %vm3321_vm0 = vcmp.eq.s32.totalorder %v2491_v13, 6  ;;  %v1603_v13 = vld [vmem:[%s3146_s3 + $0x8] sm:$0xff]  }
 0x20a   : > { %v840_v56 = vpop.permute.xlu1 %839  ;;  %v935_v34 = vpop.permute.xlu0 %934 }
 0x20b   : > { %v845_v61 = vsel %vm841_vm15, %v832_v14, %v840_v56  ;;  %v849_v2 = vsel %vm841_vm15, %v840_v56, %v832_v14 }
 0x20c   : > { %v868_v15 = vsel %vm853_vm4, %v845_v61, 0.0  ;;  %v869_v12 = vsel %vm853_vm4, %v849_v2, 0.0  ;;  %vm3322_vm4 = vmmov %vm3321_vm0 }
 0x20e   : > { %v937_v27 = vpop.permute.xlu1 %936  ;;  %v943_v16 = vpop.permute.xlu0 %942 }
 0x20f   : > { %v949_v53 = vsel %vm946_vm6, %v935_v34, %v943_v16  ;;  %v953_v40 = vsel %vm946_vm6, %v943_v16, %v935_v34  ;;  %v1157_v16 = vadd.f32 %v1141_v28, %v1133_v25 }
 0x210   : > { %v971_v4 = vsel %vm957_vm7, %v949_v53, 0.0  ;;  %v972_v8 = vsel %vm957_vm7, %v953_v40, 0.0  ;;  %vm3319_vm7 = vcmp.eq.s32.totalorder %v2484_v19, 6 }
 0x211   : > { %vm3320_vm15 = vmmov %vm3319_vm7  ;;  %v1148_v56 = vadd.f32 %v971_v4, %v866_v45  ;;  %v1149_v34 = vadd.f32 %v972_v8, %v867_v44 }
 0x212   : > { %v945_v37 = vpop.permute.xlu1 %944  ;;  %v1040_v5 = vpop.permute.xlu0 %1039 }
 0x213   : > { %v950_v52 = vsel %vm946_vm6, %v937_v27, %v945_v37  ;;  %v954_v62 = vsel %vm946_vm6, %v945_v37, %v937_v27  ;;  %v1156_v27 = vadd.f32 %v1140_v18, %v1132_v32 }
 0x214   : > { %v973_v7 = vsel %vm958_vm11, %v950_v52, 0.0  ;;  %v974_v26 = vsel %vm958_vm11, %v954_v62, 0.0  ;;  %vm3323_vm11 = vcmask 261120  }
 0x215   : > { %v1150_v46 = vadd.f32 %v973_v7, %v868_v15  ;;  %v1151_v60 = vadd.f32 %v974_v26, %v869_v12  ;;  %vm3324_vm6 = vmmov %vm3323_vm11 }
 0x216   : > { %v1042_v48 = vpop.permute.xlu1 %1041  ;;  %v1048_v3 = vpop.permute.xlu0 %1047 }
 0x217   : > { %v1054_v57 = vsel %vm1051_vm2, %v1040_v5, %v1048_v3  ;;  %v1058_v51 = vsel %vm1051_vm2, %v1048_v3, %v1040_v5 }
 0x218   : > { %v1076_v14 = vsel %vm3319_vm7, %v1054_v57, 0.0  ;;  %v1077_v21 = vsel %vm3320_vm15, %v1058_v51, 0.0 }
 0x219   : > { %v1164_v49 = vadd.f32 %v1148_v56, %v1076_v14  ;;  %v1165_v33 = vadd.f32 %v1149_v34, %v1077_v21 }
 0x21a   : > { %v1050_v24 = vpop.permute.xlu1 %1049 }
 0x21b   : > { %v1055_v54 = vsel %vm1051_vm2, %v1042_v48, %v1050_v24  ;;  %v1059_v19 = vsel %vm1051_vm2, %v1050_v24, %v1042_v48  ;;  %v1172_v42 = vadd.f32 %v1164_v49, %v1156_v27  ;;  %v1173_v31 = vadd.f32 %v1165_v33, %v1157_v16 }
 0x21c   : > { %v1078_v55 = vsel %vm3321_vm0, %v1055_v54, 0.0  ;;  %v1079_v17 = vsel %vm3322_vm4, %v1059_v19, 0.0 }
 0x21d   : > { %v1166_v29 = vadd.f32 %v1150_v46, %v1078_v55  ;;  %v1167_v23 = vadd.f32 %v1151_v60, %v1079_v17 }
 0x21f   : > { %v1174_v47 = vadd.f32 %v1166_v29, %v1158_v58  ;;  %v1175_v30 = vadd.f32 %v1167_v23, %v1159_v38 }
 0x221   : > { %v1338_v50 = vpack.c.bf16 %v1175_v30, %v1173_v31  ;;  %v1337_v59 = vpack.c.bf16 %v1174_v47, %v1172_v42 }
 0x223   : > { %1357 = vmatprep.subr.bf16.mxu0 %v1338_v50 }
 0x224   : > { %1358 = vmatpush1.bf16.msra.mxu0 %v1337_v59 }
 0x227   : > { %1535 = vmatmul.mubr.msk.bf16.vlgmr.msra.gmra.mrb[0].mxu0 %vm3323_vm11, %v1602_v10  ;;  %v1423_v20 = vpop.permute.xlu0 %1422 }
 0x228   : > { %1397 = vmatprep.mubr.bf16.mxu0 %v3219_v11 }
 0x22b   : > { %v1428_v28 = vpop.permute.xlu1 %1427  ;;  %v1438_v14 = vpop.permute.xlu0 %1437 }
 0x22f   : > { %1536 = vmatmul.mubr.msk.bf16.gmra.mrb[4].mxu0 %vm3324_vm6, %v1603_v13  ;;  %v1433_v4 = vpop.permute.xlu1 %1432 }
 0x248   : > { %v1243_v32 = vpop.f32.mrb[0].mxu1 }
 0x249   : > { %v1245_v25 = vpop.f32.mrb[1].mxu1 }
 0x24a   : > { %v1247_v22 = vpop.f32.mrb[2].mxu1 }
 0x24b   : > { %v1249_v63 = vpop.f32.mrb[3].mxu1 }
 0x29b   : > { %v1322_v6 = vpop.f32.mrb[4].mxu1 }
 0x29c   : > { %v1324_v9 = vpop.f32.mrb[5].mxu1 }
 0x29d   : > { %v1326_v37 = vpop.f32.mrb[6].mxu1 }
 0x29e   : > { %v1328_v5 = vpop.f32.mrb[7].mxu1 }
 0x2fa   : > { %v1389_v36 = vpop.f32.mrb[0].mxu0 }
 0x2fb   : > { %v1545_v53 = vadd.f32 %v1389_v36, %v1243_v32  ;;  %v1391_v40 = vpop.f32.mrb[1].mxu0 }
 0x2fc   : > { %v1546_v11 = vadd.f32 %v1391_v40, %v1245_v25  ;;  %v1393_v18 = vpop.f32.mrb[2].mxu0 }
 0x2fd   : > { %v1547_v52 = vadd.f32 %v1393_v18, %v1247_v22  ;;  %v1440_v62 = vadd.f32 %v1545_v53, %v1423_v20  ;;  %v1395_v0 = vpop.f32.mrb[3].mxu0 }
 0x2fe   : > { %v1441_v35 = vadd.f32 %v1546_v11, %v1423_v20  ;;  %v1548_v41 = vadd.f32 %v1395_v0, %v1249_v63 }
 0x2ff   : > { %1448 = vst [vmem:[%s231_s19] sm:$0xff] %v1440_v62  ;;  %v1442_v1 = vadd.f32 %v1547_v52, %v1428_v28 }
 0x300   : > { %1449 = vst [vmem:[%s231_s19 + $0x8] sm:$0xff] %v1441_v35  ;;  %v1443_v61 = vadd.f32 %v1548_v41, %v1428_v28 }
 0x301   : > { %1450 = vst [vmem:[%s231_s19 + $0x10] sm:$0xff] %v1442_v1 }
 0x302   : > { %1451 = vst [vmem:[%s231_s19 + $0x18] sm:$0xff] %v1443_v61  ;;  %v1399_v2 = vpop.f32.mrb[4].mxu0 }
 0x303   : > { %v1549_v8 = vadd.f32 %v1399_v2, %v1322_v6  ;;  %v1401_v48 = vpop.f32.mrb[5].mxu0 }
 0x304   : > { %v1550_v3 = vadd.f32 %v1401_v48, %v1324_v9  ;;  %v1403_v7 = vpop.f32.mrb[6].mxu0 }
 0x305   : > { %v1444_v26 = vadd.f32 %v1549_v8, %v1433_v4  ;;  %v1551_v57 = vadd.f32 %v1403_v7, %v1326_v37  ;;  %v1405_v51 = vpop.f32.mrb[7].mxu0 }
 0x306   : > { %v1445_v45 = vadd.f32 %v1550_v3, %v1433_v4  ;;  %v1552_v44 = vadd.f32 %v1405_v51, %v1328_v5 }
 0x307   : > { %1452 = vst [vmem:[%s231_s19 + $0x20] sm:$0xff] %v1444_v26  ;;  %v1446_v21 = vadd.f32 %v1551_v57, %v1438_v14 }
 0x308   : > { %1453 = vst [vmem:[%s231_s19 + $0x28] sm:$0xff] %v1445_v45  ;;  %v1447_v15 = vadd.f32 %v1552_v44, %v1438_v14 }
 0x309   : > { %1454 = vst [vmem:[%s231_s19 + $0x30] sm:$0xff] %v1446_v21 }
 0x30a   : > { %1455 = vst [vmem:[%s231_s19 + $0x38] sm:$0xff] %v1447_v15 }
 0x30b PF: > { %s15_s18 = sadd.s32 1, %s1610_s18  }
 0x30c   : > { %p12_p4 = scmp.ge.s32.totalorder %s15_s18, 10  }
 0x30e   :  { %14 = sbr.rel (!%p12_p4) target bundleno = 1 (0x1), region = 70 }

</bundles_post_ra>
